<compile_context>
chip_gen: v7x
topology: tpu7x:2x2x1
jax: 0.10.0
libtpu: 0.0.40
codegen_flags: <defaults>
</compile_context>

<pallas_src>
import functools

import numpy as np
import jax
import jax.numpy as jnp
from jax import lax
from jax.experimental import pallas as pl
from jax.experimental.pallas import tpu as pltpu


LANES = 128  # TPU lane width; the packed sample/joint axis is padded to this


# ----------------------------------------------------------------------------
# Pallas kernel
# ----------------------------------------------------------------------------
def _dgmstcn_kernel(x_ref, w1_ref, b1_ref, a01_ref, btc_ref, plo_ref, phi_ref,
                    m_ref, trs_ref, trt_ref, wtr_ref, bout_ref, o_ref, fs_ref,
                    *, T, rem, mid):
    r01 = (rem + mid) * T        # rows of branches 0+1 (feed the temporal conv)
    r012 = (rem + 2 * mid) * T   # rows of branches 0+1+2 (get the BN1 ReLU)
    G = x_ref.shape[0]           # lane-packed sample groups per grid step

    def one_group(g, carry):
        x = x_ref[g]                                            # (C*T, 128)

        # all four branch 1x1 convs at once (BN1 scale + conv biases folded)
        h = (jnp.dot(w1_ref[...], x, preferred_element_type=jnp.float32)
             + b1_ref[...])                                     # (tin*T, 128)
        h012 = jnp.maximum(h[:r012], 0.0)                       # BN1 -> ReLU

        # branches 0/1: fused 5-tap temporal conv + BN2, one block-diag matmul
        fs_ref[:r01] = (jnp.dot(a01_ref[...], h012[:r01],
                                preferred_element_type=jnp.float32)
                        + btc_ref[...])

        # branch 2: MaxPool(3,1); post-ReLU input >= 0, so zero-filled time
        # shifts are equivalent to nn.MaxPool2d's implicit -inf padding
        z2 = h012[r01:r012]
        fs_ref[r01:r012] = jnp.maximum(
            jnp.maximum(jnp.dot(plo_ref[...], z2,
                                preferred_element_type=jnp.float32), z2),
            jnp.dot(phi_ref[...], z2, preferred_element_type=jnp.float32))

        # branch 3: plain 1x1 conv + bias (already in h; no ReLU)
        fs_ref[r012:] = h[r012:]

        # add_coeff recombine folded into one lane-mixing (128,128) matmul
        feats = jnp.dot(fs_ref[...], m_ref[...],
                        preferred_element_type=jnp.float32)
        # transform BN affine + ReLU, then 1x1 conv with the final BN folded in
        feats = jnp.maximum(feats * trs_ref[...] + trt_ref[...], 0.0)
        o_ref[g] = (jnp.dot(wtr_ref[...], feats,
                            preferred_element_type=jnp.float32)
                    + bout_ref[...]).astype(o_ref.dtype)
        return carry

    lax.fori_loop(0, G, one_group, 0, unroll=True)


# ----------------------------------------------------------------------------
# Wrapper
# ----------------------------------------------------------------------------
def dgmstcn_pallas(x, p):
    N, C, T, V = x.shape
    Vp = V + 1
    assert Vp <= LANES, "num_joints + 1 must fit in the 128-lane axis"
    W = LANES
    B = W // Vp                        # samples packed side-by-side in lanes

    rem = int(p['b0_w1'].shape[0])
    mid = int(p['b1_w1'].shape[0])
    cout = int(p['tr_w'].shape[0])
    tin = rem + 3 * mid
    CT = C * T
    f32 = jnp.float32

    # ---- grid blocking: groups per step / number of grid steps --------------
    n_groups = -(-N // B)
    if n_groups <= 1:
        G = 1
    else:
        # amortize per-step overhead but keep >= 2 grid steps (v7x megacore)
        G = max(1, min(8, n_groups // 2))
    Nb = -(-n_groups // G)
    total_groups = Nb * G
    n_pad_samples = total_groups * B

    # ---- pack samples into the lane axis: (groups, C*T, 128) ----------------
    x_aug = jnp.concatenate([x, jnp.mean(x, axis=-1, keepdims=True)], axis=-1)
    if n_pad_samples != N:
        x_aug = jnp.concatenate(
            [x_aug, jnp.zeros((n_pad_samples - N, C, T, Vp), x_aug.dtype)],
            axis=0)
    x_packed = (x_aug.reshape(total_groups, B, C, T, Vp)
                .transpose(0, 2, 3, 1, 4)
                .reshape(total_groups, CT, B * Vp)).astype(f32)
    if B * Vp < W:
        x_packed = jnp.pad(x_packed, ((0, 0), (0, 0), (0, W - B * Vp)))

    # ---- wrapper-side constants: every linear stage as one matrix -----------
    I_T = np.eye(T, dtype=np.float32)
    # time-shift matrices: (S[d] @ z)[t] = z[t + d - 2], zero outside [0, T)
    S = np.zeros((5, T, T), np.float32)
    for d in range(5):
        for t in range(T):
            u = t + d - 2
            if 0 <= u < T:
                S[d, t, u] = 1.0
    S_j = jnp.asarray(S)

    def rep_col(v):          # per-channel vector -> per-(channel, t) column
        return jnp.repeat(jnp.asarray(v, f32), T)[:, None]

    # stacked branch 1x1 convs, BN1 scales folded into the weights
    w1_rows = jnp.concatenate([
        p['b0_s1'][:, None] * p['b0_w1'],
        p['b1_s1'][:, None] * p['b1_w1'],
        p['b2_s1'][:, None] * p['b2_w1'],
        p['b3_w'],
    ], axis=0).astype(f32)                                   # (tin, C)
    W1 = jnp.kron(w1_rows, jnp.asarray(I_T))                 # (tin*T, C*T)
    bias1 = rep_col(jnp.concatenate([
        p['b0_t1'] + p['b0_s1'] * p['b0_b1'],
        p['b1_t1'] + p['b1_s1'] * p['b1_b1'],
        p['b2_t1'] + p['b2_s1'] * p['b2_b1'],
        p['b3_b']]))                                         # (tin*T, 1)

    # fused 5-tap temporal conv + BN2 scale as a block matrix per branch
    def tconv_matrix(wt, s2):
        # (A @ z)[o*T + t] = s2[o] * sum_{c,d} wt[o,c,d] * z[c*T + t + d - 2]
        A = jnp.einsum('ocd,dtu->octu', jnp.asarray(wt, f32), S_j)
        A = A * jnp.asarray(s2, f32)[:, None, None, None]
        co, ci = wt.shape[0], wt.shape[1]
        return A.transpose(0, 2, 1, 3).reshape(co * T, ci * T)

    n01 = (rem + mid) * T
    A01 = jnp.zeros((n01, n01), f32)
    A01 = A01.at[:rem * T, :rem * T].set(tconv_matrix(p['b0_wt'], p['b0_s2']))
    A01 = A01.at[rem * T:, rem * T:].set(tconv_matrix(p['b1_wt'], p['b1_s2']))
    btc = rep_col(jnp.concatenate([
        p['b0_t2'] + p['b0_s2'] * p['b0_bt'],
        p['b1_t2'] + p['b1_s2'] * p['b1_bt']]))              # ((rem+mid)*T, 1)

    # max-pool time shifts (kernel 3, pad 1) for branch 2
    Plo = jnp.asarray(np.kron(np.eye(mid, dtype=np.float32), S[1]))
    Phi = jnp.asarray(np.kron(np.eye(mid, dtype=np.float32), S[3]))

    # add_coeff recombine folded into one lane-mixing matrix:
    #   local_lane_out = local_lane + coeff[v] * global_lane_of_same_sample
    sel = np.zeros((W, W), np.float32)
    for g in range(B):
        base = g * Vp
        sel[base + V, base:base + V] = 1.0
    coeff_lane = jnp.concatenate([p['coeff'][:V].astype(f32),
                                  jnp.zeros((1,), f32)])
    coeff_lane = jnp.pad(jnp.tile(coeff_lane, (B,)), (0, W - B * Vp))
    M = jnp.eye(W, dtype=f32) + jnp.asarray(sel) * coeff_lane[None, :]

    # transform: BN affine columns; 1x1 conv with final BN scale / bias folded
    trs = rep_col(p['tr_s'])
    trt = rep_col(p['tr_t'])
    Wtr = jnp.kron((p['f_s'][:, None] * p['tr_w']).astype(f32),
                   jnp.asarray(I_T))                         # (cout*T, tin*T)
    bout = rep_col(p['f_t'] + p['f_s'] * p['tr_b'])          # (cout*T, 1)

    consts = [W1, bias1, A01, btc, Plo, Phi, M, trs, trt, Wtr, bout]
    consts = [jnp.asarray(c, f32) for c in consts]

    def const_spec(a):
        return pl.BlockSpec(a.shape, lambda i: (0,) * a.ndim)

    kernel = functools.partial(_dgmstcn_kernel, T=T, rem=rem, mid=mid)

    out_packed = pl.pallas_call(
        kernel,
        out_shape=jax.ShapeDtypeStruct((total_groups, cout * T, W), f32),
        grid=(Nb,),
        in_specs=[pl.BlockSpec((G, CT, W), lambda i: (i, 0, 0))]
                 + [const_spec(c) for c in consts],
        out_specs=pl.BlockSpec((G, cout * T, W), lambda i: (i, 0, 0)),
        scratch_shapes=[pltpu.VMEM((tin * T, W), f32)],
        compiler_params=pltpu.CompilerParams(
            dimension_semantics=("parallel",)),
    )(x_packed, *consts)

    # ---- unpack lanes -> (N, cout, T, V) -------------------------------------
    out = out_packed.reshape(total_groups, cout, T, W)[..., :B * Vp]
    out = (out.reshape(total_groups, cout, T, B, Vp)
           .transpose(0, 3, 1, 2, 4)
           .reshape(n_pad_samples, cout, T, Vp))
    return out[:N, :, :, :V]


# ----------------------------------------------------------------------------
# Deterministic parameter init (shapes follow dgmstcn.__init__)
# ----------------------------------------------------------------------------
def init_params(key, c_in, c_out, num_joints):
    num_branches = 4                  # ms_cfg = [(5,1), (5,2), ('max',3), '1x1']
    mid = c_out // num_branches
    rem = c_out - mid * (num_branches - 1)
    tin = mid * (num_branches - 1) + rem
    eps = 1e-5

    def bn_affine(c):
        gamma = jnp.ones((c,), jnp.float32)    # bn weight init = 1
        beta = jnp.zeros((c,), jnp.float32)    # bn bias init = 0
        mean = jnp.zeros((c,), jnp.float32)    # running mean
        var = jnp.ones((c,), jnp.float32)      # running var
        scale = gamma / jnp.sqrt(var + eps)
        shift = beta - mean * scale
        return scale, shift

    ks = iter(jax.random.split(key, 24))

    def kaiming(k, shape, fan_out):
        return (jax.random.normal(k, shape) * np.sqrt(2.0 / fan_out)).astype(jnp.float32)

    def bias(k, c):
        return (jax.random.normal(k, (c,)) * 0.01).astype(jnp.float32)

    p = {}
    # branch 0: cfg (5, 1)
    p['b0_w1'] = kaiming(next(ks), (rem, c_in), rem)
    p['b0_b1'] = bias(next(ks), rem)
    p['b0_s1'], p['b0_t1'] = bn_affine(rem)
    p['b0_wt'] = kaiming(next(ks), (rem, rem, 5), rem * 5)
    p['b0_bt'] = jnp.zeros((rem,), jnp.float32)       # conv_init: bias = 0
    p['b0_s2'], p['b0_t2'] = bn_affine(rem)
    # branch 1: cfg (5, 2) (dilation entry unused by unit_tcn)
    p['b1_w1'] = kaiming(next(ks), (mid, c_in), mid)
    p['b1_b1'] = bias(next(ks), mid)
    p['b1_s1'], p['b1_t1'] = bn_affine(mid)
    p['b1_wt'] = kaiming(next(ks), (mid, mid, 5), mid * 5)
    p['b1_bt'] = jnp.zeros((mid,), jnp.float32)
    p['b1_s2'], p['b1_t2'] = bn_affine(mid)
    # branch 2: ('max', 3)
    p['b2_w1'] = kaiming(next(ks), (mid, c_in), mid)
    p['b2_b1'] = bias(next(ks), mid)
    p['b2_s1'], p['b2_t1'] = bn_affine(mid)
    # branch 3: '1x1'
    p['b3_w'] = kaiming(next(ks), (mid, c_in), mid)
    p['b3_b'] = bias(next(ks), mid)
    # transform: BN -> ReLU -> 1x1 conv (tin -> c_out)
    p['tr_s'], p['tr_t'] = bn_affine(tin)
    p['tr_w'] = kaiming(next(ks), (c_out, tin), c_out)
    p['tr_b'] = bias(next(ks), c_out)
    # final BN
    p['f_s'], p['f_t'] = bn_affine(c_out)
    # add_coeff: PyTorch inits to zeros; use small deterministic nonzero values
    # here so the global-joint path is actually exercised.
    p['coeff'] = ((jnp.arange(num_joints, dtype=jnp.float32)
                   - num_joints / 2.0) * 0.01)
    return p


# ----------------------------------------------------------------------------
# Pure-JAX reference (mirrors the torch inner_forward / forward literally)
# ----------------------------------------------------------------------------
def dgmstcn_reference(x, p):
    N, C, T, V = x.shape
    xa = jnp.concatenate([x, jnp.mean(x, axis=-1, keepdims=True)], axis=-1)

    def c1(z, w, b):
        return jnp.einsum('nctv,oc->notv', z, w) + b[None, :, None, None]

    def aff(z, s, t):
        return z * s[None, :, None, None] + t[None, :, None, None]

    relu = lambda z: jnp.maximum(z, 0.0)

    def tc5(z, w, b):
        zp = jnp.pad(z, ((0, 0), (0, 0), (2, 2), (0, 0)))
        out = sum(jnp.einsum('nctv,oc->notv', zp[:, :, d:d + T, :], w[:, :, d])
                  for d in range(5))
        return out + b[None, :, None, None]

    def mp3(z):
        zp = jnp.pad(z, ((0, 0), (0, 0), (1, 1), (0, 0)),
                     constant_values=-jnp.inf)
        return jnp.maximum(jnp.maximum(zp[:, :, 0:T, :], zp[:, :, 1:T + 1, :]),
                           zp[:, :, 2:T + 2, :])

    h0 = aff(tc5(relu(aff(c1(xa, p['b0_w1'], p['b0_b1']), p['b0_s1'], p['b0_t1'])),
                 p['b0_wt'], p['b0_bt']), p['b0_s2'], p['b0_t2'])
    h1 = aff(tc5(relu(aff(c1(xa, p['b1_w1'], p['b1_b1']), p['b1_s1'], p['b1_t1'])),
                 p['b1_wt'], p['b1_bt']), p['b1_s2'], p['b1_t2'])
    h2 = mp3(relu(aff(c1(xa, p['b2_w1'], p['b2_b1']), p['b2_s1'], p['b2_t1'])))
    h3 = c1(xa, p['b3_w'], p['b3_b'])

    out = jnp.concatenate([h0, h1, h2, h3], axis=1)      # (N, tin, T, V+1)
    local = out[..., :V]
    glob = out[..., V]                                   # (N, tin, T)
    gfeat = jnp.einsum('nct,v->nctv', glob, p['coeff'][:V])
    feat = local + gfeat
    feat = c1(relu(aff(feat, p['tr_s'], p['tr_t'])), p['tr_w'], p['tr_b'])
    return aff(feat, p['f_s'], p['f_t'])                 # dropout(p=0) = identity


# ----------------------------------------------------------------------------
if __name__ == "__main__":
    key = jax.random.PRNGKey(0)
    kx, kp = jax.random.split(key)

    # small shapes; V == num_joints (module default 25). N=6 exercises both
    # lane packing (4 samples / 128 lanes) and the zero-sample padding path,
    # and yields 2 parallel grid steps.
    N, C_IN, T, V = 6, 4, 16, 25
    C_OUT = 8

    x = jax.random.normal(kx, (N, C_IN, T, V), dtype=jnp.float32)
    params = init_params(kp, C_IN, C_OUT, V)

    out = dgmstcn_pallas(x, params)
    out = jax.block_until_ready(out)
    assert out.shape == (N, C_OUT, T, V), out.shape

    ref = dgmstcn_reference(x, params)
    err = float(jnp.max(jnp.abs(out - ref)))
    # tolerance leaves headroom for reduced-precision MXU passes on the
    # (now 4-deep) chain of f32 matmuls; typical error is far smaller
    assert err < 2e-2, f"mismatch vs reference: max abs err = {err}"

    print("KERNEL_OK")
</pallas_src>

<mosaic_0001>
module attributes {stable_mosaic.version = 11 : i64} {
  func.func @_dgmstcn_kernel(%arg0: i32, %arg1: memref<1x64x128xf32, #tpu.memory_space<vmem>>, %arg2: memref<128x64xf32, #tpu.memory_space<vmem>>, %arg3: memref<128x1xf32, #tpu.memory_space<vmem>>, %arg4: memref<64x64xf32, #tpu.memory_space<vmem>>, %arg5: memref<64x1xf32, #tpu.memory_space<vmem>>, %arg6: memref<32x32xf32, #tpu.memory_space<vmem>>, %arg7: memref<32x32xf32, #tpu.memory_space<vmem>>, %arg8: memref<128x128xf32, #tpu.memory_space<vmem>>, %arg9: memref<128x1xf32, #tpu.memory_space<vmem>>, %arg10: memref<128x1xf32, #tpu.memory_space<vmem>>, %arg11: memref<128x128xf32, #tpu.memory_space<vmem>>, %arg12: memref<128x1xf32, #tpu.memory_space<vmem>>, %arg13: memref<1x128x128xf32, #tpu.memory_space<vmem>>, %arg14: memref<128x128xf32, #tpu.memory_space<vmem>>) attributes {dimension_semantics = [#tpu.dimension_semantics<parallel>], iteration_bounds = array<i64: 2>, scalar_prefetch = 0 : i64, scratch_operands = 1 : i64, tpu.core_type = #tpu.core_type<tc>, window_params = [{transform_indices = @transform_0, window_bounds = array<i64: 1, 64, 128>}, {pipeline_mode = #tpu.pipeline_mode<synchronous>, transform_indices = @transform_1, window_bounds = array<i64: 128, 64>}, {pipeline_mode = #tpu.pipeline_mode<synchronous>, transform_indices = @transform_2, window_bounds = array<i64: 128, 1>}, {pipeline_mode = #tpu.pipeline_mode<synchronous>, transform_indices = @transform_3, window_bounds = array<i64: 64, 64>}, {pipeline_mode = #tpu.pipeline_mode<synchronous>, transform_indices = @transform_4, window_bounds = array<i64: 64, 1>}, {pipeline_mode = #tpu.pipeline_mode<synchronous>, transform_indices = @transform_5, window_bounds = array<i64: 32, 32>}, {pipeline_mode = #tpu.pipeline_mode<synchronous>, transform_indices = @transform_6, window_bounds = array<i64: 32, 32>}, {pipeline_mode = #tpu.pipeline_mode<synchronous>, transform_indices = @transform_7, window_bounds = array<i64: 128, 128>}, {pipeline_mode = #tpu.pipeline_mode<synchronous>, transform_indices = @transform_8, window_bounds = array<i64: 128, 1>}, {pipeline_mode = #tpu.pipeline_mode<synchronous>, transform_indices = @transform_9, window_bounds = array<i64: 128, 1>}, {pipeline_mode = #tpu.pipeline_mode<synchronous>, transform_indices = @transform_10, window_bounds = array<i64: 128, 128>}, {pipeline_mode = #tpu.pipeline_mode<synchronous>, transform_indices = @transform_11, window_bounds = array<i64: 128, 1>}, {transform_indices = @transform_12, window_bounds = array<i64: 1, 128, 128>}]} {
    %c0_i32 = arith.constant 0 : i32
    %0 = arith.index_cast %c0_i32 : i32 to index
    %c0 = arith.constant 0 : index
    %c0_0 = arith.constant 0 : index
    %1 = vector.load %arg1[%0, %c0, %c0_0] : memref<1x64x128xf32, #tpu.memory_space<vmem>>, vector<1x64x128xf32>
    %2 = vector.shape_cast %1 : vector<1x64x128xf32> to vector<64x128xf32>
    %c0_1 = arith.constant 0 : index
    %c0_2 = arith.constant 0 : index
    %3 = vector.load %arg2[%c0_1, %c0_2] : memref<128x64xf32, #tpu.memory_space<vmem>>, vector<128x64xf32>
    %cst = arith.constant dense<0.000000e+00> : vector<128x128xf32>
    %4 = tpu.matmul %3, %2, %cst {dimension_numbers = #tpu.dot_dimension_numbers<[1], [0], [0], [1], [0, 0, 1, 1], [], []>} : vector<128x64xf32>, vector<64x128xf32>, vector<128x128xf32> -> vector<128x128xf32>
    %c0_3 = arith.constant 0 : index
    %c0_4 = arith.constant 0 : index
    %5 = vector.load %arg3[%c0_3, %c0_4] : memref<128x1xf32, #tpu.memory_space<vmem>>, vector<128x1xf32>
    %6 = vector.broadcast %5 : vector<128x1xf32> to vector<128x128xf32>
    %7 = arith.addf %4, %6 : vector<128x128xf32>
    %8 = vector.extract_strided_slice %7 {offsets = [0, 0], sizes = [96, 128], strides = [1, 1]} : vector<128x128xf32> to vector<96x128xf32>
    %cst_5 = arith.constant 0.000000e+00 : f32
    %9 = vector.broadcast %cst_5 : f32 to vector<96x128xf32>
    %10 = arith.maximumf %8, %9 : vector<96x128xf32>
    %c0_6 = arith.constant 0 : index
    %c0_7 = arith.constant 0 : index
    %11 = vector.load %arg4[%c0_6, %c0_7] : memref<64x64xf32, #tpu.memory_space<vmem>>, vector<64x64xf32>
    %12 = vector.extract_strided_slice %10 {offsets = [0, 0], sizes = [64, 128], strides = [1, 1]} : vector<96x128xf32> to vector<64x128xf32>
    %cst_8 = arith.constant dense<0.000000e+00> : vector<64x128xf32>
    %13 = tpu.matmul %11, %12, %cst_8 {dimension_numbers = #tpu.dot_dimension_numbers<[1], [0], [0], [1], [0, 0, 1, 1], [], []>} : vector<64x64xf32>, vector<64x128xf32>, vector<64x128xf32> -> vector<64x128xf32>
    %c0_9 = arith.constant 0 : index
    %c0_10 = arith.constant 0 : index
    %14 = vector.load %arg5[%c0_9, %c0_10] : memref<64x1xf32, #tpu.memory_space<vmem>>, vector<64x1xf32>
    %15 = vector.broadcast %14 : vector<64x1xf32> to vector<64x128xf32>
    %16 = arith.addf %13, %15 : vector<64x128xf32>
    %c0_11 = arith.constant 0 : index
    %c0_12 = arith.constant 0 : index
    %17 = vector.load %arg14[%c0_11, %c0_12] : memref<128x128xf32, #tpu.memory_space<vmem>>, vector<64x128xf32>
    tpu.vector_store %arg14[%c0_11, %c0_12], %16 {strides = array<i32>} : memref<128x128xf32, #tpu.memory_space<vmem>>, vector<64x128xf32>,
    %18 = vector.extract_strided_slice %10 {offsets = [64, 0], sizes = [32, 128], strides = [1, 1]} : vector<96x128xf32> to vector<32x128xf32>
    %c0_13 = arith.constant 0 : index
    %c0_14 = arith.constant 0 : index
    %19 = vector.load %arg6[%c0_13, %c0_14] : memref<32x32xf32, #tpu.memory_space<vmem>>, vector<32x32xf32>
    %cst_15 = arith.constant dense<0.000000e+00> : vector<32x128xf32>
    %20 = tpu.matmul %19, %18, %cst_15 {dimension_numbers = #tpu.dot_dimension_numbers<[1], [0], [0], [1], [0, 0, 1, 1], [], []>} : vector<32x32xf32>, vector<32x128xf32>, vector<32x128xf32> -> vector<32x128xf32>
    %21 = arith.maximumf %20, %18 : vector<32x128xf32>
    %c0_16 = arith.constant 0 : index
    %c0_17 = arith.constant 0 : index
    %22 = vector.load %arg7[%c0_16, %c0_17] : memref<32x32xf32, #tpu.memory_space<vmem>>, vector<32x32xf32>
    %cst_18 = arith.constant dense<0.000000e+00> : vector<32x128xf32>
    %23 = tpu.matmul %22, %18, %cst_18 {dimension_numbers = #tpu.dot_dimension_numbers<[1], [0], [0], [1], [0, 0, 1, 1], [], []>} : vector<32x32xf32>, vector<32x128xf32>, vector<32x128xf32> -> vector<32x128xf32>
    %24 = arith.maximumf %21, %23 : vector<32x128xf32>
    %c64 = arith.constant 64 : index
    %c0_19 = arith.constant 0 : index
    %25 = vector.load %arg14[%c64, %c0_19] : memref<128x128xf32, #tpu.memory_space<vmem>>, vector<32x128xf32>
    tpu.vector_store %arg14[%c64, %c0_19], %24 {strides = array<i32>} : memref<128x128xf32, #tpu.memory_space<vmem>>, vector<32x128xf32>,
    %26 = vector.extract_strided_slice %7 {offsets = [96, 0], sizes = [32, 128], strides = [1, 1]} : vector<128x128xf32> to vector<32x128xf32>
    %c96 = arith.constant 96 : index
    %c0_20 = arith.constant 0 : index
    %27 = vector.load %arg14[%c96, %c0_20] : memref<128x128xf32, #tpu.memory_space<vmem>>, vector<32x128xf32>
    tpu.vector_store %arg14[%c96, %c0_20], %26 {strides = array<i32>} : memref<128x128xf32, #tpu.memory_space<vmem>>, vector<32x128xf32>,
    %c0_21 = arith.constant 0 : index
    %c0_22 = arith.constant 0 : index
    %28 = vector.load %arg14[%c0_21, %c0_22] : memref<128x128xf32, #tpu.memory_space<vmem>>, vector<128x128xf32>
    %c0_23 = arith.constant 0 : index
    %c0_24 = arith.constant 0 : index
    %29 = vector.load %arg8[%c0_23, %c0_24] : memref<128x128xf32, #tpu.memory_space<vmem>>, vector<128x128xf32>
    %cst_25 = arith.constant dense<0.000000e+00> : vector<128x128xf32>
    %30 = tpu.matmul %28, %29, %cst_25 {dimension_numbers = #tpu.dot_dimension_numbers<[1], [0], [0], [1], [0, 0, 1, 1], [], []>} : vector<128x128xf32>, vector<128x128xf32>, vector<128x128xf32> -> vector<128x128xf32>
    %c0_26 = arith.constant 0 : index
    %c0_27 = arith.constant 0 : index
    %31 = vector.load %arg9[%c0_26, %c0_27] : memref<128x1xf32, #tpu.memory_space<vmem>>, vector<128x1xf32>
    %32 = vector.broadcast %31 : vector<128x1xf32> to vector<128x128xf32>
    %33 = arith.mulf %30, %32 : vector<128x128xf32>
    %c0_28 = arith.constant 0 : index
    %c0_29 = arith.constant 0 : index
    %34 = vector.load %arg10[%c0_28, %c0_29] : memref<128x1xf32, #tpu.memory_space<vmem>>, vector<128x1xf32>
    %35 = vector.broadcast %34 : vector<128x1xf32> to vector<128x128xf32>
    %36 = arith.addf %33, %35 : vector<128x128xf32>
    %cst_30 = arith.constant 0.000000e+00 : f32
    %37 = vector.broadcast %cst_30 : f32 to vector<128x128xf32>
    %38 = arith.maximumf %36, %37 : vector<128x128xf32>
    %c0_31 = arith.constant 0 : index
    %c0_32 = arith.constant 0 : index
    %39 = vector.load %arg11[%c0_31, %c0_32] : memref<128x128xf32, #tpu.memory_space<vmem>>, vector<128x128xf32>
    %cst_33 = arith.constant dense<0.000000e+00> : vector<128x128xf32>
    %40 = tpu.matmul %39, %38, %cst_33 {dimension_numbers = #tpu.dot_dimension_numbers<[1], [0], [0], [1], [0, 0, 1, 1], [], []>} : vector<128x128xf32>, vector<128x128xf32>, vector<128x128xf32> -> vector<128x128xf32>
    %c0_34 = arith.constant 0 : index
    %c0_35 = arith.constant 0 : index
    %41 = vector.load %arg12[%c0_34, %c0_35] : memref<128x1xf32, #tpu.memory_space<vmem>>, vector<128x1xf32>
    %42 = vector.broadcast %41 : vector<128x1xf32> to vector<128x128xf32>
    %43 = arith.addf %40, %42 : vector<128x128xf32>
    %44 = arith.index_cast %c0_i32 : i32 to index
    %c0_36 = arith.constant 0 : index
    %c0_37 = arith.constant 0 : index
    %45 = vector.load %arg13[%44, %c0_36, %c0_37] : memref<1x128x128xf32, #tpu.memory_space<vmem>>, vector<1x128x128xf32>
    %46 = vector.shape_cast %45 : vector<1x128x128xf32> to vector<128x128xf32>
    %47 = vector.shape_cast %43 : vector<128x128xf32> to vector<1x128x128xf32>
    tpu.vector_store %arg13[%44, %c0_36, %c0_37], %47 {strides = array<i32>} : memref<1x128x128xf32, #tpu.memory_space<vmem>>, vector<1x128x128xf32>,
    %c1_i32 = arith.constant 1 : i32
    return
  }
  func.func @transform_0(%arg0: i32) -> (i32, i32, i32) {
    %c0_i32 = arith.constant 0 : i32
    %c0_i32_0 = arith.constant 0 : i32
    %c0_i32_1 = arith.constant 0 : i32
    return %arg0, %c0_i32, %c0_i32_0 : i32, i32, i32
  }
  func.func @transform_1(%arg0: i32) -> (i32, i32) {
    %c0_i32 = arith.constant 0 : i32
    %c0_i32_0 = arith.constant 0 : i32
    %c0_i32_1 = arith.constant 0 : i32
    return %c0_i32, %c0_i32_0 : i32, i32
  }
  func.func @transform_2(%arg0: i32) -> (i32, i32) {
    %c0_i32 = arith.constant 0 : i32
    %c0_i32_0 = arith.constant 0 : i32
    %c0_i32_1 = arith.constant 0 : i32
    return %c0_i32, %c0_i32_0 : i32, i32
  }
  func.func @transform_3(%arg0: i32) -> (i32, i32) {
    %c0_i32 = arith.constant 0 : i32
    %c0_i32_0 = arith.constant 0 : i32
    %c0_i32_1 = arith.constant 0 : i32
    return %c0_i32, %c0_i32_0 : i32, i32
  }
  func.func @transform_4(%arg0: i32) -> (i32, i32) {
    %c0_i32 = arith.constant 0 : i32
    %c0_i32_0 = arith.constant 0 : i32
    %c0_i32_1 = arith.constant 0 : i32
    return %c0_i32, %c0_i32_0 : i32, i32
  }
  func.func @transform_5(%arg0: i32) -> (i32, i32) {
    %c0_i32 = arith.constant 0 : i32
    %c0_i32_0 = arith.constant 0 : i32
    %c0_i32_1 = arith.constant 0 : i32
    return %c0_i32, %c0_i32_0 : i32, i32
  }
  func.func @transform_6(%arg0: i32) -> (i32, i32) {
    %c0_i32 = arith.constant 0 : i32
    %c0_i32_0 = arith.constant 0 : i32
    %c0_i32_1 = arith.constant 0 : i32
    return %c0_i32, %c0_i32_0 : i32, i32
  }
  func.func @transform_7(%arg0: i32) -> (i32, i32) {
    %c0_i32 = arith.constant 0 : i32
    %c0_i32_0 = arith.constant 0 : i32
    %c0_i32_1 = arith.constant 0 : i32
    return %c0_i32, %c0_i32_0 : i32, i32
  }
  func.func @transform_8(%arg0: i32) -> (i32, i32) {
    %c0_i32 = arith.constant 0 : i32
    %c0_i32_0 = arith.constant 0 : i32
    %c0_i32_1 = arith.constant 0 : i32
    return %c0_i32, %c0_i32_0 : i32, i32
  }
  func.func @transform_9(%arg0: i32) -> (i32, i32) {
    %c0_i32 = arith.constant 0 : i32
    %c0_i32_0 = arith.constant 0 : i32
    %c0_i32_1 = arith.constant 0 : i32
    return %c0_i32, %c0_i32_0 : i32, i32
  }
  func.func @transform_10(%arg0: i32) -> (i32, i32) {
    %c0_i32 = arith.constant 0 : i32
    %c0_i32_0 = arith.constant 0 : i32
    %c0_i32_1 = arith.constant 0 : i32
    return %c0_i32, %c0_i32_0 : i32, i32
  }
  func.func @transform_11(%arg0: i32) -> (i32, i32) {
    %c0_i32 = arith.constant 0 : i32
    %c0_i32_0 = arith.constant 0 : i32
    %c0_i32_1 = arith.constant 0 : i32
    return %c0_i32, %c0_i32_0 : i32, i32
  }
  func.func @transform_12(%arg0: i32) -> (i32, i32, i32) {
    %c0_i32 = arith.constant 0 : i32
    %c0_i32_0 = arith.constant 0 : i32
    %c0_i32_1 = arith.constant 0 : i32
    return %arg0, %c0_i32, %c0_i32_0 : i32, i32, i32
  }
}

</mosaic_0001>

<bundles_post_ra>
// kernel: tpu_custom_call.1
= control target key start
LH: loop header
LB: loop body
LE: loop exit
PB: predicated region body
PF: predicated region fallthrough
CT: control target
= control target key end

     0   :  { %17 = vsyncpa [#allocation4], 0  ;;  %s3210_s0 = inlined_call_operand.vmem [shape: f32[2,64,128], index: 0, kind: input, shape index: {}]   ;;  %s3211_s1 = inlined_call_operand.vmem [shape: f32[128,64], index: 1, kind: input, shape index: {}]   ;;  %s3212_s2 = inlined_call_operand.vmem [shape: f32[128,1], index: 2, kind: input, shape index: {}]   ;;  %s3213_s3 = inlined_call_operand.vmem [shape: f32[64,64], index: 3, kind: input, shape index: {}]   ;;  %s3214_s4 = inlined_call_operand.vmem [shape: f32[64,1], index: 4, kind: input, shape index: {}]   ;;  %s3215_s5 = inlined_call_operand.vmem [shape: f32[32,32], index: 5, kind: input, shape index: {}]   ;;  %s3216_s6 = inlined_call_operand.vmem [shape: f32[32,32], index: 6, kind: input, shape index: {}]   ;;  %s3217_s7 = inlined_call_operand.vmem [shape: f32[128,128], index: 7, kind: input, shape index: {}]   ;;  %s3218_s8 = inlined_call_operand.vmem [shape: f32[128,1], index: 8, kind: input, shape index: {}]   ;;  %s3219_s9 = inlined_call_operand.vmem [shape: f32[128,1], index: 9, kind: input, shape index: {}]   ;;  %s3220_s10 = inlined_call_operand.vmem [shape: f32[128,128], index: 10, kind: input, shape index: {}]   ;;  %s3221_s11 = inlined_call_operand.vmem [shape: f32[128,1], index: 11, kind: input, shape index: {}]   ;;  %s3222_s12 = inlined_call_operand.hbm [shape: f32[2,128,128], index: 12, kind: output, shape index: {}]  }
   0x1   :  { %19 = vsyncpa [#allocation4 + $0x1], 0  ;;  %s2595_s21 = smov 0   ;;  %s2597_s22 = smov 0  }
   0x2   :  { %s2599_s23 = smov 0   ;;  %s2601_s24 = smov 0  }
   0x3 LB: > { %3224 = sst [smem:[#allocation6_spill]] %s2520_s23  ;;  %s2616_s25 = sadd.s32 4294967295, %s2524_s24   ;;  %s2524_s24 = sphi %s2601_s24, %s3232_s24   ;;  %s2520_s23 = sphi %s2599_s23, %s3229_s23   ;;  %s2516_s22 = sphi %s2597_s22, %s3231_s22   ;;  %s2512_s21 = sphi %s2595_s21, %s3230_s21  }
   0x4   : > { %s1916_s26 = sadd.s32 4294967294, %s2524_s24   ;;  %s2620_s27 = sadd.s32 1, %s2524_s24  }
   0x5   : > { %s289_s28 = sadd.s32 1, %s2520_s23  ;;  %s286_s29 = ssub.s32 %s2524_s24, %s2620_s27 }
   0x6   : > { %p299_p0 = scmp.ne.s32.totalorder %s2520_s23, %s2516_s22  ;;  %p287_p1 = scmp.eq.s32.totalorder %s286_s29, 0 }
   0x7   : > { %p300_p2 = scmp.eq.s32.totalorder %s2616_s25, 1  ;;  %p305_p3 = scmp.ne.s32.totalorder %s2516_s22, %s2512_s21 }
   0x8   : > { %p306_p4 = scmp.eq.s32.totalorder %s1916_s26, 1  ;;  %p1919_p7 = scmp.ge.s32.totalorder %s2524_s24, 1 }
   0x9   : > { %s2631_s30 = scalar_select %p287_p1, %s2520_s23, %s289_s28  }
   0xa   : > { %p2633_p5 = por %p300_p2, %p299_p0  ;;  %p2637_p6 = por %p306_p4, %p305_p3 }
   0xb   : > { %3225 = sst [smem:[#allocation7_spill]] %s2631_s30  ;;  %p365_p8 = scmp.lt.s32.totalorder %s2524_s24, 3 }
   0xd   : > { %p366_p9 = pnand %p1919_p7, %p365_p8 }
   0xe   : > { %v438_v0 = vld [vmem:[%s3212_s2 + $0x10] sm:$0xff] (!%p366_p9)  ;;  %v436_v1 = vld [vmem:[%s3212_s2] sm:$0xff] (!%p366_p9)  ;;  %p407_p10 = scmp.lt.s32.totalorder (!%p366_p9), %s2616_s25, 1  ;;  %v2526_v2 = vmov (!%p366_p9), 0   ;;  %vm532_vm0 = vcmask (!%p366_p9), 523264   ;;  %v439_v3 = vld [vmem:[%s3212_s2 + $0x18] sm:$0xff] (!%p366_p9) }
   0xf   : > { %369 = sbr.rel (%p366_p9) target bundleno = 1003 (0x3eb), region = 68  ;;  %2461 = vset.pattern.permute.xlu1 (!%p366_p9), %v2526_v2  ;;  %2460 = vset.pattern.permute.xlu0 (!%p366_p9), %v2526_v2  ;;  %v437_v4 = vld [vmem:[%s3212_s2 + $0x8] sm:$0xff] (!%p366_p9)  ;;  %v420_v5 = vld [vmem:[%s3211_s1] sm:$0xff] (!%p366_p9)  ;;  %v443_v16 = vld [vmem:[%s3212_s2 + $0x38] sm:$0xff] (!%p366_p9)  ;;  %vm935_vm1 = vcmask (!%p366_p9), 261120   ;;  %s404_s18 = sand.u32 (!%p366_p9), 1, %s2516_s22  }
  0x10   : > { %464 = vperm.xlu1 (!%p366_p9), %2461, %v438_v0   ;;  %454 = vperm.xlu0 (!%p366_p9), %2460, %v436_v1   ;;  %v441_v10 = vld [vmem:[%s3212_s2 + $0x28] sm:$0xff] (!%p366_p9)  ;;  %v440_v11 = vld [vmem:[%s3212_s2 + $0x20] sm:$0xff] (!%p366_p9)  ;;  %v442_v17 = vld [vmem:[%s3212_s2 + $0x30] sm:$0xff] (!%p366_p9)  ;;  %s1920_s20 = sshll.u32 (!%p366_p9), %s404_s18, 7  ;;  %s2527_s16 = smov (!%p366_p9), [#allocation3]  }
  0x11   : > { %2098 = vmatprep.mubr.msk.f32.mxu0 (!%p366_p9), %vm532_vm0, %v420_v5  ;;  %v445_v21 = vld [vmem:[%s3212_s2 + $0x48] sm:$0xff] (!%p366_p9)  ;;  %v444_v22 = vld [vmem:[%s3212_s2 + $0x40] sm:$0xff] (!%p366_p9)  ;;  %v447_v24 = vld [vmem:[%s3212_s2 + $0x58] sm:$0xff] (!%p366_p9)  ;;  %s3140_s26 = scalar_lea.vmem (!%p366_p9), [#allocation3], %s1920_s20  ;;  %s2466_s17 = sshll.u32 (!%p366_p9), %s2527_s16, 4  ;;  %s2467_s17 = int_to_ptr.vmem [resolvable:$false] %s2466_s17 }
  0x12   : > { %v446_v25 = vld [vmem:[%s3212_s2 + $0x50] sm:$0xff] (!%p366_p9)  ;;  %v421_v26 = vld [vmem:[%s3211_s1 + $0x8] sm:$0xff] (!%p366_p9)  ;;  %v746_v28 = vld [vmem:[%s3214_s4] sm:$0xff] (!%p366_p9)  ;;  %s1854_s28 = sshll.u32 (!%p366_p9), %s3140_s26, 4  ;;  %s2468_s20 = scalar_lea.vmem (!%p366_p9), %s2467_s17, 4096  ;;  %s3163_s28 = int_to_ptr.vmem [resolvable:$true] %s1854_s28 }
  0x13   : > { %v747_v27 = vld [vmem:[%s3214_s4 + $0x8] sm:$0xff] (!%p366_p9)  ;;  %v422_v29 = vld [vmem:[%s3211_s1 + $0x10] sm:$0xff] (!%p366_p9)  ;;  %v423_v30 = vld [vmem:[%s3211_s1 + $0x18] sm:$0xff] (!%p366_p9)  ;;  %p2469_p0 = scmp.lt.s32.totalorder (!%p366_p9), %s3163_s28, %s2467_s17 }
  0x14   : > { %469 = vperm.xlu1 (!%p366_p9), %2461, %v439_v3   ;;  %459 = vperm.xlu0 (!%p366_p9), %2460, %v437_v4   ;;  %v749_v31 = vld [vmem:[%s3214_s4 + $0x18] sm:$0xff] (!%p366_p9)  ;;  %v748_v32 = vld [vmem:[%s3214_s4 + $0x10] sm:$0xff] (!%p366_p9)  ;;  %v424_v33 = vld [vmem:[%s3211_s1 + $0x20] sm:$0xff] (!%p366_p9) }
  0x15   : > { %v425_v34 = vld [vmem:[%s3211_s1 + $0x28] sm:$0xff] (!%p366_p9)  ;;  %v750_v36 = vld [vmem:[%s3214_s4 + $0x20] sm:$0xff] (!%p366_p9)  ;;  %v426_v37 = vld [vmem:[%s3211_s1 + $0x30] sm:$0xff] (!%p366_p9) }
  0x16   : > { %s408_s19 = scalar_select %p407_p10, %s2616_s25, 1  ;;  %v751_v35 = vld [vmem:[%s3214_s4 + $0x28] sm:$0xff]  ;;  %v427_v38 = vld [vmem:[%s3211_s1 + $0x38] sm:$0xff]  ;;  %v752_v40 = vld [vmem:[%s3214_s4 + $0x30] sm:$0xff] }
  0x17   : > { %v753_v39 = vld [vmem:[%s3214_s4 + $0x38] sm:$0xff]  ;;  %v428_v41 = vld [vmem:[%s3211_s1 + $0x40] sm:$0xff]  ;;  %v429_v42 = vld [vmem:[%s3211_s1 + $0x48] sm:$0xff] }
  0x18   : > { %s1960_s15 = sshll.u32 %s408_s19, 6  ;;  %479 = vperm.xlu1 %2461, %v441_v10   ;;  %474 = vperm.xlu0 %2460, %v440_v11   ;;  %v449_v43 = vld [vmem:[%s3212_s2 + $0x68] sm:$0xff]  ;;  %v448_v44 = vld [vmem:[%s3212_s2 + $0x60] sm:$0xff]  ;;  %v430_v45 = vld [vmem:[%s3211_s1 + $0x50] sm:$0xff]  ;;  %s1961_s19 = sshll.u32 %s2616_s25, 11 }
  0x19   : > { %s411_s23 = scalar_lea.vmem %s3210_s0, %s1960_s15  ;;  %v431_v46 = vld [vmem:[%s3211_s1 + $0x58] sm:$0xff]  ;;  %v450_v48 = vld [vmem:[%s3212_s2 + $0x70] sm:$0xff]  ;;  %v432_v49 = vld [vmem:[%s3211_s1 + $0x60] sm:$0xff]  ;;  %s3161_s29 = scalar_lea.hbm %s3222_s12, %s1961_s19 }
  0x1a   : > { %v412_v6 = vld [vmem:[%s411_s23] sm:$0xff]  ;;  %v413_v7 = vld [vmem:[%s411_s23 + $0x8] sm:$0xff]  ;;  %v414_v8 = vld [vmem:[%s411_s23 + $0x10] sm:$0xff]  ;;  %s3169_s25 = scalar_lea.sflag [#allocation4], %s404_s18  ;;  %s2462_s15 = scalar_lea.vmem %s3163_s28, 2048 }
  0x1b   : > { %v2290_v9 = vpack.c.bf16 %v413_v7, %v412_v6  ;;  %v415_v12 = vld [vmem:[%s411_s23 + $0x18] sm:$0xff]  ;;  %v416_v14 = vld [vmem:[%s411_s23 + $0x20] sm:$0xff]  ;;  %v417_v15 = vld [vmem:[%s411_s23 + $0x28] sm:$0xff]  ;;  %p2463_p11 = scmp.ne.s32.totalorder %s3163_s28, %s2462_s15  ;;  %p2470_p1 = scmp.lt.s32.totalorder %s2468_s20, %s2462_s15 }
  0x1c   : > { %v2294_v13 = vpack.c.bf16 %v415_v12, %v414_v8  ;;  %v2298_v18 = vpack.c.bf16 %v417_v15, %v416_v14  ;;  %v418_v19 = vld [vmem:[%s411_s23 + $0x30] sm:$0xff]  ;;  %v419_v20 = vld [vmem:[%s411_s23 + $0x38] sm:$0xff]  ;;  %489 = vperm.xlu1 %2461, %v443_v16   ;;  %484 = vperm.xlu0 %2460, %v442_v17   ;;  %v433_v50 = vld [vmem:[%s3211_s1 + $0x68] sm:$0xff] }
  0x1d   : > { %2291 = vmatprep.subr.bf16.mxu0 %v2290_v9  ;;  %v2302_v23 = vpack.c.bf16 %v419_v20, %v418_v19  ;;  %v451_v47 = vld [vmem:[%s3212_s2 + $0x78] sm:$0xff]  ;;  %v1328_v51 = vld [vmem:[%s3218_s8 + $0x8] sm:$0xff]  ;;  %v1327_v52 = vld [vmem:[%s3218_s8] sm:$0xff]  ;;  %p2464_p12 = pnand %p2463_p11, %p2633_p5  ;;  %p2471_p2 = por %p2470_p1, %p2469_p0 }
  0x1e   : > { %2293 = vmatpush3.bf16.msra.mxu0 %v2290_v9  ;;  %v434_v53 = vld [vmem:[%s3211_s1 + $0x70] sm:$0xff]  ;;  %v435_v54 = vld [vmem:[%s3211_s1 + $0x78] sm:$0xff]  ;;  %v1440_v55 = vld [vmem:[%s3219_s9 + $0x8] sm:$0xff] }
  0x1f   : > { %2295 = vmatprep.subr.bf16.mxu0 %v2294_v13  ;;  %v1439_v56 = vld [vmem:[%s3219_s9] sm:$0xff]  ;;  %v1330_v57 = vld [vmem:[%s3218_s8 + $0x18] sm:$0xff]  ;;  %v1329_v58 = vld [vmem:[%s3218_s8 + $0x10] sm:$0xff]  ;;  %p2465_p13 = pneg %p2464_p12 }
  0x20   : > { %499 = vperm.xlu1 %2461, %v445_v21   ;;  %494 = vperm.xlu0 %2460, %v444_v22   ;;  %v1442_v59 = vld [vmem:[%s3219_s9 + $0x18] sm:$0xff]  ;;  %v1441_v60 = vld [vmem:[%s3219_s9 + $0x10] sm:$0xff]  ;;  %v1332_v61 = vld [vmem:[%s3218_s8 + $0x28] sm:$0xff] }
  0x21   : > { %v1331_v62 = vld [vmem:[%s3218_s8 + $0x20] sm:$0xff]  ;;  %v1444_v63 = vld [vmem:[%s3219_s9 + $0x28] sm:$0xff]  ;;  %v1334_v1 = vld [vmem:[%s3218_s8 + $0x38] sm:$0xff]  ;;  %p2472_p3 = pnand %p2471_p2, %p2465_p13 }
  0x22   : > { %2297 = vmatpush3.bf16.msra.mxu0 %v2294_v13  ;;  %v1443_v0 = vld [vmem:[%s3219_s9 + $0x20] sm:$0xff]  ;;  %v1333_v2 = vld [vmem:[%s3218_s8 + $0x30] sm:$0xff]  ;;  %v1446_v3 = vld [vmem:[%s3219_s9 + $0x38] sm:$0xff] }
  0x23   : > { %2299 = vmatprep.subr.bf16.mxu0 %v2298_v18  ;;  %v1445_v4 = vld [vmem:[%s3219_s9 + $0x30] sm:$0xff]  ;;  %v1336_v5 = vld [vmem:[%s3218_s8 + $0x48] sm:$0xff]  ;;  %v1335_v6 = vld [vmem:[%s3218_s8 + $0x40] sm:$0xff] }
  0x24   : > { %509 = vperm.xlu1 %2461, %v447_v24   ;;  %504 = vperm.xlu0 %2460, %v446_v25   ;;  %v1448_v7 = vld [vmem:[%s3219_s9 + $0x48] sm:$0xff]  ;;  %v1447_v8 = vld [vmem:[%s3219_s9 + $0x40] sm:$0xff]  ;;  %v1338_v9 = vld [vmem:[%s3218_s8 + $0x58] sm:$0xff] }
  0x25   : > { %v1337_v10 = vld [vmem:[%s3218_s8 + $0x50] sm:$0xff]  ;;  %v1450_v11 = vld [vmem:[%s3219_s9 + $0x58] sm:$0xff]  ;;  %v1340_v13 = vld [vmem:[%s3218_s8 + $0x68] sm:$0xff] }
  0x26   : > { %2301 = vmatpush3.bf16.msra.mxu0 %v2298_v18  ;;  %v1449_v12 = vld [vmem:[%s3219_s9 + $0x50] sm:$0xff]  ;;  %v1339_v14 = vld [vmem:[%s3218_s8 + $0x60] sm:$0xff]  ;;  %v1452_v15 = vld [vmem:[%s3219_s9 + $0x68] sm:$0xff] }
  0x27   : > { %2303 = vmatprep.subr.bf16.mxu0 %v2302_v23  ;;  %v1451_v16 = vld [vmem:[%s3219_s9 + $0x60] sm:$0xff]  ;;  %v1342_v17 = vld [vmem:[%s3218_s8 + $0x78] sm:$0xff]  ;;  %v1341_v18 = vld [vmem:[%s3218_s8 + $0x70] sm:$0xff] }
  0x28   : > { %761 = vperm.xlu1 %2461, %v747_v27   ;;  %756 = vperm.xlu0 %2460, %v746_v28   ;;  %v1454_v19 = vld [vmem:[%s3219_s9 + $0x78] sm:$0xff]  ;;  %v1453_v20 = vld [vmem:[%s3219_s9 + $0x70] sm:$0xff]  ;;  %v1584_v21 = vld [vmem:[%s3221_s11 + $0x8] sm:$0xff] }
  0x29   : > { %v1583_v22 = vld [vmem:[%s3221_s11] sm:$0xff]  ;;  %v1585_v24 = vld [vmem:[%s3221_s11 + $0x10] sm:$0xff]  ;;  %v1588_v25 = vld [vmem:[%s3221_s11 + $0x28] sm:$0xff] }
  0x2a   : > { %2305 = vmatpush3.bf16.msra.mxu0 %v2302_v23  ;;  %v1586_v23 = vld [vmem:[%s3221_s11 + $0x18] sm:$0xff]  ;;  %v1589_v28 = vld [vmem:[%s3221_s11 + $0x30] sm:$0xff] }
  0x2b   : > { %v1590_v27 = vld [vmem:[%s3221_s11 + $0x38] sm:$0xff] }
  0x2c   : > { %771 = vperm.xlu1 %2461, %v749_v31   ;;  %766 = vperm.xlu0 %2460, %v748_v32   ;;  %v1594_v31 = vld [vmem:[%s3221_s11 + $0x58] sm:$0xff]  ;;  %v738_v32 = vld [vmem:[%s3213_s3] sm:$0xff] }
  0x2d   : > { %2099 = vmatmul.mubr.msk.f32.vlgmr.msra.gmra.mrb[0].mxu0 %vm532_vm0, %v421_v26  ;;  %v1587_v26 = vld [vmem:[%s3221_s11 + $0x20] sm:$0xff]  ;;  %2138 = vmatprep.mubr.msk.f32.mxu1 %vm532_vm0, %v738_v32 }
  0x2e   : > { %2101 = vmatprep.mubr.msk.f32.mxu0 %vm532_vm0, %v422_v29  ;;  %v1592_v29 = vld [vmem:[%s3221_s11 + $0x48] sm:$0xff] }
  0x30   : > { %781 = vperm.xlu1 %2461, %v751_v35   ;;  %776 = vperm.xlu0 %2460, %v750_v36   ;;  %v1595_v35 = vld [vmem:[%s3221_s11 + $0x60] sm:$0xff]  ;;  %v1598_v36 = vld [vmem:[%s3221_s11 + $0x78] sm:$0xff] }
  0x31   : > { %2102 = vmatmul.mubr.msk.f32.gmra.mrb[2].mxu0 %vm532_vm0, %v423_v30  ;;  %v1591_v30 = vld [vmem:[%s3221_s11 + $0x40] sm:$0xff] }
  0x32   : > { %2104 = vmatprep.mubr.msk.f32.mxu0 %vm532_vm0, %v424_v33  ;;  %v1593_v33 = vld [vmem:[%s3221_s11 + $0x50] sm:$0xff] }
  0x34   : > { %791 = vperm.xlu1 %2461, %v753_v39   ;;  %786 = vperm.xlu0 %2460, %v752_v40   ;;  %v1167_v39 = vld [vmem:[%s3217_s7 + $0x8] sm:$0xff]  ;;  %v1168_v40 = vld [vmem:[%s3217_s7 + $0x10] sm:$0xff] }
  0x35   : > { %2105 = vmatmul.mubr.msk.f32.gmra.mrb[4].mxu0 %vm532_vm0, %v425_v34  ;;  %v1596_v34 = vld [vmem:[%s3221_s11 + $0x68] sm:$0xff] }
  0x36   : > { %2107 = vmatprep.mubr.msk.f32.mxu0 %vm532_vm0, %v426_v37  ;;  %v1597_v37 = vld [vmem:[%s3221_s11 + $0x70] sm:$0xff] }
  0x38   : > { %519 = vperm.xlu1 %2461, %v449_v43   ;;  %514 = vperm.xlu0 %2460, %v448_v44   ;;  %v1170_v44 = vld [vmem:[%s3217_s7 + $0x20] sm:$0xff] }
  0x39   : > { %2108 = vmatmul.mubr.msk.f32.gmra.mrb[6].mxu0 %vm532_vm0, %v427_v38  ;;  %v1166_v38 = vld [vmem:[%s3217_s7] sm:$0xff] }
  0x3a   : > { %2110 = vmatprep.mubr.msk.f32.mxu0 %vm532_vm0, %v428_v41  ;;  %v2338_v41 = vpack.c.bf16 %v1167_v39, %v1166_v38 }
  0x3c   : > { %529 = vperm.xlu1 %2461, %v451_v47   ;;  %524 = vperm.xlu0 %2460, %v450_v48   ;;  %v1172_v47 = vld [vmem:[%s3217_s7 + $0x30] sm:$0xff]  ;;  %v1173_v48 = vld [vmem:[%s3217_s7 + $0x38] sm:$0xff] }
  0x3d   : > { %2111 = vmatmul.mubr.msk.f32.gmra.mrb[8].mxu0 %vm532_vm0, %v429_v42  ;;  %v1169_v42 = vld [vmem:[%s3217_s7 + $0x18] sm:$0xff]  ;;  %2339 = vmatprep.subr.bf16.mxu0 %v2338_v41 }
  0x3e   : > { %2113 = vmatprep.mubr.msk.f32.mxu0 %vm532_vm0, %v430_v45  ;;  %v2342_v43 = vpack.c.bf16 %v1169_v42, %v1168_v40  ;;  %v1171_v45 = vld [vmem:[%s3217_s7 + $0x28] sm:$0xff]  ;;  %2341 = vmatpush3.bf16.msra.mxu0 %v2338_v41 }
  0x40   : > { %1350 = vperm.xlu1 %2461, %v1328_v51   ;;  %1345 = vperm.xlu0 %2460, %v1327_v52   ;;  %v1175_v51 = vld [vmem:[%s3217_s7 + $0x48] sm:$0xff] }
  0x41   : > { %2114 = vmatmul.mubr.msk.f32.gmra.mrb[10].mxu0 %vm532_vm0, %v431_v46  ;;  %2343 = vmatprep.subr.bf16.mxu0 %v2342_v43  ;;  %v2346_v46 = vpack.c.bf16 %v1171_v45, %v1170_v44  ;;  %v739_v44 = vld [vmem:[%s3213_s3 + $0x8] sm:$0xff] }
  0x42   : > { %2116 = vmatprep.mubr.msk.f32.mxu0 %vm532_vm0, %v432_v49  ;;  %2345 = vmatpush3.bf16.msra.mxu0 %v2342_v43  ;;  %v2350_v49 = vpack.c.bf16 %v1173_v48, %v1172_v47  ;;  %v740_v47 = vld [vmem:[%s3213_s3 + $0x10] sm:$0xff] }
  0x43   : > { %2347 = vmatprep.subr.bf16.mxu0 %v2346_v46 }
  0x44   : > { %1462 = vperm.xlu1 %2461, %v1440_v55   ;;  %1457 = vperm.xlu0 %2460, %v1439_v56   ;;  %v1178_v56 = vld [vmem:[%s3217_s7 + $0x60] sm:$0xff] }
  0x45   : > { %2117 = vmatmul.mubr.msk.f32.gmra.mrb[12].mxu0 %vm532_vm0, %v433_v50  ;;  %v1174_v50 = vld [vmem:[%s3217_s7 + $0x40] sm:$0xff] }
  0x46   : > { %2119 = vmatprep.mubr.msk.f32.mxu0 %vm532_vm0, %v434_v53  ;;  %2349 = vmatpush3.bf16.msra.mxu0 %v2346_v46  ;;  %v2354_v52 = vpack.c.bf16 %v1175_v51, %v1174_v50  ;;  %v1176_v53 = vld [vmem:[%s3217_s7 + $0x50] sm:$0xff] }
  0x47   : > { %2351 = vmatprep.subr.bf16.mxu0 %v2350_v49 }
  0x48   : > { %1360 = vperm.xlu1 %2461, %v1330_v57   ;;  %1355 = vperm.xlu0 %2460, %v1329_v58   ;;  %v1179_v57 = vld [vmem:[%s3217_s7 + $0x68] sm:$0xff] }
  0x49   : > { %2120 = vmatmul.mubr.msk.f32.gmra.mrb[14].mxu0 %vm532_vm0, %v435_v54  ;;  %v1177_v54 = vld [vmem:[%s3217_s7 + $0x58] sm:$0xff]  ;;  %v2362_v58 = vpack.c.bf16 %v1179_v57, %v1178_v56  ;;  %v743_v57 = vld [vmem:[%s3213_s3 + $0x28] sm:$0xff] }
  0x4a   : > { %2353 = vmatpush3.bf16.msra.mxu0 %v2350_v49  ;;  %v2358_v55 = vpack.c.bf16 %v1177_v54, %v1176_v53  ;;  %v742_v54 = vld [vmem:[%s3213_s3 + $0x20] sm:$0xff] }
  0x4b   : > { %2355 = vmatprep.subr.bf16.mxu0 %v2354_v52 }
  0x4c   : > { %1472 = vperm.xlu1 %2461, %v1442_v59   ;;  %1467 = vperm.xlu0 %2460, %v1441_v60  }
  0x4e   : > { %2357 = vmatpush3.bf16.msra.mxu0 %v2354_v52  ;;  %v741_v52 = vld [vmem:[%s3213_s3 + $0x18] sm:$0xff] }
  0x4f   : > { %2359 = vmatprep.subr.bf16.mxu0 %v2358_v55 }
  0x50   : > { %1370 = vperm.xlu1 %2461, %v1332_v61   ;;  %1365 = vperm.xlu0 %2460, %v1331_v62  }
  0x52   : > { %2361 = vmatpush3.bf16.msra.mxu0 %v2358_v55 }
  0x53   : > { %2363 = vmatprep.subr.bf16.mxu0 %v2362_v58 }
  0x54   : > { %1482 = vperm.xlu1 %2461, %v1444_v63   ;;  %1477 = vperm.xlu0 %2460, %v1443_v0  }
  0x56   : > { %2365 = vmatpush3.bf16.msra.mxu0 %v2362_v58  ;;  %v744_v58 = vld [vmem:[%s3213_s3 + $0x30] sm:$0xff] }
  0x58   : > { %1380 = vperm.xlu1 %2461, %v1334_v1   ;;  %1375 = vperm.xlu0 %2460, %v1333_v2  }
  0x5c   : > { %1492 = vperm.xlu1 %2461, %v1446_v3   ;;  %1487 = vperm.xlu0 %2460, %v1445_v4  }
  0x60   : > { %1390 = vperm.xlu1 %2461, %v1336_v5   ;;  %1385 = vperm.xlu0 %2460, %v1335_v6  }
  0x64   : > { %1502 = vperm.xlu1 %2461, %v1448_v7   ;;  %1497 = vperm.xlu0 %2460, %v1447_v8  }
  0x68   : > { %1400 = vperm.xlu1 %2461, %v1338_v9   ;;  %1395 = vperm.xlu0 %2460, %v1337_v10  }
  0x6c   : > { %1512 = vperm.xlu1 %2461, %v1450_v11   ;;  %1507 = vperm.xlu0 %2460, %v1449_v12  }
  0x70   : > { %1410 = vperm.xlu1 %2461, %v1340_v13   ;;  %1405 = vperm.xlu0 %2460, %v1339_v14  }
  0x74   : > { %1522 = vperm.xlu1 %2461, %v1452_v15   ;;  %1517 = vperm.xlu0 %2460, %v1451_v16  }
  0x78   : > { %1420 = vperm.xlu1 %2461, %v1342_v17   ;;  %1415 = vperm.xlu0 %2460, %v1341_v18  }
  0x7c   : > { %1532 = vperm.xlu1 %2461, %v1454_v19   ;;  %1527 = vperm.xlu0 %2460, %v1453_v20  }
  0x80   : > { %1606 = vperm.xlu1 %2461, %v1584_v21   ;;  %1601 = vperm.xlu0 %2460, %v1583_v22  }
  0x84   : > { %1616 = vperm.xlu1 %2461, %v1586_v23   ;;  %1611 = vperm.xlu0 %2460, %v1585_v24  }
  0x88   : > { %1626 = vperm.xlu1 %2461, %v1588_v25   ;;  %1621 = vperm.xlu0 %2460, %v1587_v26  }
  0x8c   : > { %1636 = vperm.xlu1 %2461, %v1590_v27   ;;  %1631 = vperm.xlu0 %2460, %v1589_v28  }
  0x8f   : > { %v465_v59 = vpop.permute.xlu1 %464  ;;  %v455_v60 = vpop.permute.xlu0 %454 }
  0x90   : > { %1646 = vperm.xlu1 %2461, %v1592_v29   ;;  %1641 = vperm.xlu0 %2460, %v1591_v30  }
  0x93   : > { %v470_v61 = vpop.permute.xlu1 %469  ;;  %v460_v62 = vpop.permute.xlu0 %459 }
  0x94   : > { %1656 = vperm.xlu1 %2461, %v1594_v31   ;;  %1651 = vperm.xlu0 %2460, %v1593_v33  }
  0x97   : > { %v480_v2 = vpop.permute.xlu1 %479  ;;  %v475_v4 = vpop.permute.xlu0 %474 }
  0x98   : > { %1666 = vperm.xlu1 %2461, %v1596_v34   ;;  %1661 = vperm.xlu0 %2460, %v1595_v35  }
  0x9b   : > { %v490_v13 = vpop.permute.xlu1 %489  ;;  %v485_v16 = vpop.permute.xlu0 %484 }
  0x9c   : > { %1676 = vperm.xlu1 %2461, %v1598_v36   ;;  %1671 = vperm.xlu0 %2460, %v1597_v37  }
  0x9f   : > { %v500_v26 = vpop.permute.xlu1 %499  ;;  %v495_v29 = vpop.permute.xlu0 %494 }
  0xa3   : > { %v510_v38 = vpop.permute.xlu1 %509  ;;  %v505_v41 = vpop.permute.xlu0 %504 }
 0x100   : > { %v2100_v63 = vpop.f32.mrb[0].mxu0 }
 0x101   : > { %v653_v0 = vadd.f32 %v2100_v63, %v460_v62  ;;  %v647_v1 = vpop.f32.mrb[1].mxu0  ;;  %v933_v62 = vld [vmem:[%s3215_s5 + $0x10] sm:$0xff]  ;;  %v934_v63 = vld [vmem:[%s3215_s5 + $0x18] sm:$0xff] }
 0x102   : > { %v648_v3 = vadd.f32 %v647_v1, %v455_v60  ;;  %v931_v60 = vld [vmem:[%s3215_s5] sm:$0xff]  ;;  %v1038_v1 = vld [vmem:[%s3216_s6 + $0x8] sm:$0xff] }
 0x103   : > { %v727_v5 = vmax.f32 %v653_v0, 0.0  ;;  %v1037_v0 = vld [vmem:[%s3216_s6] sm:$0xff] }
 0x104   : > { %v726_v6 = vmax.f32 %v648_v3, 0.0  ;;  %v2103_v7 = vpop.f32.mrb[2].mxu0  ;;  %v1040_v3 = vld [vmem:[%s3216_s6 + $0x18] sm:$0xff] }
 0x105   : > { %v663_v8 = vadd.f32 %v2103_v7, %v470_v61  ;;  %v657_v9 = vpop.f32.mrb[3].mxu0  ;;  %v932_v61 = vld [vmem:[%s3215_s5 + $0x8] sm:$0xff]  ;;  %v757_v7 = vpop.permute.xlu0 %756 }
 0x106   : > { %v658_v10 = vadd.f32 %v657_v9, %v465_v59  ;;  %v2306_v11 = vpack.c.bf16 %v727_v5, %v726_v6  ;;  %v745_v59 = vld [vmem:[%s3213_s3 + $0x38] sm:$0xff] }
 0x107   : > { %v729_v12 = vmax.f32 %v663_v8, 0.0  ;;  %v1181_v5 = vld [vmem:[%s3217_s7 + $0x78] sm:$0xff]  ;;  %v762_v8 = vpop.permute.xlu1 %761 }
 0x108   : > { %v728_v14 = vmax.f32 %v658_v10, 0.0  ;;  %v2106_v15 = vpop.f32.mrb[4].mxu0  ;;  %2307 = vmatprep.subr.bf16.mxu1 %v2306_v11 }
 0x109   : > { %v673_v17 = vadd.f32 %v2106_v15, %v480_v2  ;;  %v667_v18 = vpop.f32.mrb[5].mxu0  ;;  %2309 = vmatpush3.bf16.msra.mxu1 %v2306_v11  ;;  %v1039_v2 = vld [vmem:[%s3216_s6 + $0x10] sm:$0xff]  ;;  %v767_v10 = vpop.permute.xlu0 %766 }
 0x10a   : > { %v2310_v19 = vpack.c.bf16 %v729_v12, %v728_v14  ;;  %v668_v20 = vadd.f32 %v667_v18, %v475_v4  ;;  %v1180_v4 = vld [vmem:[%s3217_s7 + $0x70] sm:$0xff] }
 0x10b   : > { %v731_v21 = vmax.f32 %v673_v17, 0.0  ;;  %v2366_v6 = vpack.c.bf16 %v1181_v5, %v1180_v4  ;;  %v772_v12 = vpop.permute.xlu1 %771 }
 0x10c   : > { %v730_v22 = vmax.f32 %v668_v20, 0.0  ;;  %v2109_v23 = vpop.f32.mrb[6].mxu0  ;;  %2311 = vmatprep.subr.bf16.mxu1 %v2310_v19 }
 0x10d   : > { %v683_v24 = vadd.f32 %v2109_v23, %v490_v13  ;;  %v677_v25 = vpop.f32.mrb[7].mxu0  ;;  %2313 = vmatpush3.bf16.msra.mxu1 %v2310_v19  ;;  %2367 = vmatprep.subr.bf16.mxu0 %v2366_v6  ;;  %v777_v18 = vpop.permute.xlu0 %776 }
 0x10e   : > { %v2314_v27 = vpack.c.bf16 %v731_v21, %v730_v22  ;;  %v678_v28 = vadd.f32 %v677_v25, %v485_v16  ;;  %2369 = vmatpush3.bf16.msra.mxu0 %v2366_v6 }
 0x10f   : > { %v733_v30 = vmax.f32 %v683_v24, 0.0  ;;  %v782_v20 = vpop.permute.xlu1 %781 }
 0x110   : > { %v732_v31 = vmax.f32 %v678_v28, 0.0  ;;  %v2112_v32 = vpop.f32.mrb[8].mxu0  ;;  %2315 = vmatprep.subr.bf16.mxu1 %v2314_v27 }
 0x111   : > { %v2974_v33 = vadd.f32 %v2112_v32, %v500_v26  ;;  %v687_v34 = vpop.f32.mrb[9].mxu0  ;;  %2317 = vmatpush3.bf16.msra.mxu1 %v2314_v27  ;;  %v787_v26 = vpop.permute.xlu0 %786 }
 0x112   : > { %v2318_v35 = vpack.c.bf16 %v733_v30, %v732_v31  ;;  %v2976_v36 = vadd.f32 %v687_v34, %v495_v29 }
 0x113   : > { %v735_v37 = vmax.f32 %v2974_v33, 0.0  ;;  %v792_v28 = vpop.permute.xlu1 %791 }
 0x114   : > { %v734_v39 = vmax.f32 %v2976_v36, 0.0  ;;  %v2115_v40 = vpop.f32.mrb[10].mxu0  ;;  %2319 = vmatprep.subr.bf16.mxu1 %v2318_v35 }
 0x115   : > { %v2980_v42 = vadd.f32 %v2115_v40, %v510_v38  ;;  %v697_v43 = vpop.f32.mrb[11].mxu0  ;;  %2321 = vmatpush3.bf16.msra.mxu1 %v2318_v35 }
 0x116   : > { %v2322_v45 = vpack.c.bf16 %v735_v37, %v734_v39  ;;  %v2989_v46 = vadd.f32 %v697_v43, %v505_v41 }
 0x117   : > { %v737_v48 = vmax.f32 %v2980_v42, 0.0 }
 0x118   : > { %v736_v49 = vmax.f32 %v2989_v46, 0.0  ;;  %v2996_v50 = vpop.f32.mrb[12].mxu0  ;;  %2139 = vmatmul.mubr.msk.f32.vlgmr.msra.gmra.mrb[0].mxu1 %vm532_vm0, %v739_v44  ;;  %2323 = vmatprep.subr.bf16.mxu1 %v2322_v45 }
 0x119   : > { %v2999_v51 = vpop.f32.mrb[13].mxu0  ;;  %2325 = vmatpush3.bf16.msra.mxu1 %v2322_v45  ;;  %2141 = vmatprep.mubr.msk.f32.mxu1 %vm532_vm0, %v740_v47 }
 0x11a   : > { %v2326_v53 = vpack.c.bf16 %v737_v48, %v736_v49 }
 0x11c   : > { %v3012_v55 = vpop.f32.mrb[14].mxu0  ;;  %2142 = vmatmul.mubr.msk.f32.gmra.mrb[2].mxu1 %vm532_vm0, %v741_v52  ;;  %2327 = vmatprep.subr.bf16.mxu1 %v2326_v53 }
 0x11d   : > { %v3015_v56 = vpop.f32.mrb[15].mxu0  ;;  %2329 = vmatpush3.bf16.msra.mxu1 %v2326_v53  ;;  %2144 = vmatprep.mubr.msk.f32.mxu1 %vm532_vm0, %v742_v54  ;;  %v515_v54 = vpop.permute.xlu0 %514 }
 0x11e   : > { %2331 = vmatprep.subr.bf16.mxu1 %v2322_v45  ;;  %v708_v36 = vadd.f32 %v2999_v51, %v515_v54  ;;  %v1573_v51 = vld [vmem:[%s3220_s10 + $0x30] sm:$0xff] }
 0x120   : > { %2145 = vmatmul.mubr.msk.f32.gmra.mrb[4].mxu1 %vm532_vm0, %v743_v57 }
 0x121   : > { %2147 = vmatprep.mubr.msk.f32.mxu1 %vm532_vm0, %v744_v58 }
 0x124   : > { %2148 = vmatmul.mubr.msk.f32.gmra.mrb[6].mxu1 %vm532_vm0, %v745_v59  ;;  %v1567_v59 = vld [vmem:[%s3220_s10] sm:$0xff] }
 0x125   : > { %2158 = vmatprep.mubr.msk.f32.mxu1 %vm935_vm1, %v931_v60 }
 0x128   : > { %2159 = vmatmul.mubr.msk.f32.vlgmr.msra.gmra.mrb[8].mxu1 %vm935_vm1, %v932_v61 }
 0x129   : > { %2333 = vmatpush3.bf16.msra.mxu1 %v2322_v45  ;;  %2161 = vmatprep.mubr.msk.f32.mxu1 %vm935_vm1, %v933_v62 }
 0x12a   : > { %2335 = vmatprep.subr.bf16.mxu1 %v2326_v53 }
 0x12c   : > { %2162 = vmatmul.mubr.msk.f32.gmra.mrb[10].mxu1 %vm935_vm1, %v934_v63 }
 0x12d   : > { %2337 = vmatpush3.bf16.msra.mxu1 %v2326_v53  ;;  %2172 = vmatprep.mubr.msk.f32.mxu1 %vm935_vm1, %v1037_v0 }
 0x130   : > { %2173 = vmatmul.mubr.msk.f32.vlgmr.msra.gmra.mrb[12].mxu1 %vm935_vm1, %v1038_v1 }
 0x131   : > { %2175 = vmatprep.mubr.msk.f32.mxu1 %vm935_vm1, %v1039_v2 }
 0x134   : > { %2176 = vmatmul.mubr.msk.f32.gmra.mrb[14].mxu1 %vm935_vm1, %v1040_v3 }
 0x135   : > { %2275 = vmatprep.mubr.f32.mxu1 %v1573_v51 }
 0x1eb   : > { %v2140_v9 = vpop.f32.mrb[0].mxu1 }
 0x1ec   : > { %v884_v11 = vpop.f32.mrb[1].mxu1  ;;  %v890_v14 = vadd.f32 %v2140_v9, %v762_v8 }
 0x1ed   : > { %v885_v13 = vadd.f32 %v884_v11, %v757_v7 }
 0x1ef   : > { %v2143_v15 = vpop.f32.mrb[2].mxu1  ;;  %2210 = vmatprep.mubr.f32.mxu0 %v885_v13 }
 0x1f0   : > { %v894_v16 = vpop.f32.mrb[3].mxu1  ;;  %2211 = vmatmul.mubr.f32.vlgmr.msra.gmra.mrb[16].mxu0 %v890_v14  ;;  %v900_v19 = vadd.f32 %v2143_v15, %v772_v12 }
 0x1f1   : > { %v895_v17 = vadd.f32 %v894_v16, %v767_v10 }
 0x1f3   : > { %v2146_v21 = vpop.f32.mrb[4].mxu1  ;;  %2213 = vmatprep.mubr.f32.mxu0 %v895_v17 }
 0x1f4   : > { %v904_v22 = vpop.f32.mrb[5].mxu1  ;;  %2214 = vmatmul.mubr.f32.gmra.mrb[18].mxu0 %v900_v19  ;;  %v910_v24 = vadd.f32 %v2146_v21, %v782_v20 }
 0x1f5   : > { %v905_v23 = vadd.f32 %v904_v22, %v777_v18 }
 0x1f7   : > { %v2149_v25 = vpop.f32.mrb[6].mxu1  ;;  %2216 = vmatprep.mubr.f32.mxu0 %v905_v23 }
 0x1f8   : > { %v914_v27 = vpop.f32.mrb[7].mxu1  ;;  %2217 = vmatmul.mubr.f32.gmra.mrb[20].mxu0 %v910_v24  ;;  %v920_v30 = vadd.f32 %v2149_v25, %v792_v28 }
 0x1f9   : > { %v915_v29 = vadd.f32 %v914_v27, %v787_v26 }
 0x1fb   : > { %v2160_v31 = vpop.f32.mrb[8].mxu1  ;;  %2219 = vmatprep.mubr.f32.mxu0 %v915_v29 }
 0x1fc   : > { %v1014_v32 = vpop.f32.mrb[9].mxu1  ;;  %2220 = vmatmul.mubr.f32.gmra.mrb[22].mxu0 %v920_v30  ;;  %v1034_v38 = vmax.f32 %v2160_v31, %v735_v37  ;;  %v520_v37 = vpop.permute.xlu1 %519 }
 0x1fd   : > { %v1033_v40 = vmax.f32 %v1014_v32, %v734_v39  ;;  %v525_v39 = vpop.permute.xlu0 %524  ;;  %v713_v42 = vadd.f32 %v2996_v50, %v520_v37 }
 0x1ff   : > { %v2163_v34 = vpop.f32.mrb[10].mxu1 }
 0x200   : > { %v1024_v35 = vpop.f32.mrb[11].mxu1  ;;  %v1036_v47 = vmax.f32 %v2163_v34, %v737_v48  ;;  %v718_v48 = vadd.f32 %v3015_v56, %v525_v39  ;;  %v530_v46 = vpop.permute.xlu1 %529 }
 0x201   : > { %v1035_v52 = vmax.f32 %v1024_v35, %v736_v49  ;;  %v723_v49 = vadd.f32 %v3012_v55, %v530_v46  ;;  %v1346_v50 = vpop.permute.xlu0 %1345 }
 0x203   : > { %v2174_v41 = vpop.f32.mrb[12].mxu1 }
 0x204   : > { %v1139_v43 = vmax.f32 %v1034_v38, %v2174_v41  ;;  %v1119_v44 = vpop.f32.mrb[13].mxu1  ;;  %v1351_v60 = vpop.permute.xlu1 %1350 }
 0x205   : > { %v1138_v45 = vmax.f32 %v1033_v40, %v1119_v44  ;;  %v1458_v56 = vpop.permute.xlu0 %1457 }
 0x207   : > { %v2177_v53 = vpop.f32.mrb[14].mxu1  ;;  %2222 = vmatprep.mubr.f32.mxu0 %v1138_v45 }
 0x208   : > { %v1141_v57 = vmax.f32 %v1036_v47, %v2177_v53  ;;  %v1129_v58 = vpop.f32.mrb[15].mxu1  ;;  %2223 = vmatmul.mubr.f32.gmra.mrb[24].mxu0 %v1139_v43  ;;  %v1463_v61 = vpop.permute.xlu1 %1462 }
 0x209   : > { %v1140_v33 = vmax.f32 %v1035_v52, %v1129_v58  ;;  %v1356_v63 = vpop.permute.xlu0 %1355 }
 0x20b   : > { %2225 = vmatprep.mubr.f32.mxu0 %v1140_v33 }
 0x20c   : > { %2226 = vmatmul.mubr.f32.gmra.mrb[26].mxu0 %v1141_v57  ;;  %v1361_v62 = vpop.permute.xlu1 %1360 }
 0x20d   : > { %2228 = vmatprep.mubr.f32.mxu0 %v708_v36  ;;  %v1468_v1 = vpop.permute.xlu0 %1467 }
 0x210   : > { %2229 = vmatmul.mubr.f32.gmra.mrb[28].mxu0 %v713_v42  ;;  %v1473_v0 = vpop.permute.xlu1 %1472 }
 0x211   : > { %2231 = vmatprep.mubr.f32.mxu0 %v718_v48  ;;  %v1366_v2 = vpop.permute.xlu0 %1365 }
 0x214   : > { %2232 = vmatmul.mubr.f32.gmra.mrb[30].mxu0 %v723_v49  ;;  %v1371_v55 = vpop.permute.xlu1 %1370 }
 0x215   : > { %2266 = vmatprep.mubr.f32.mxu0 %v1567_v59  ;;  %v1478_v4 = vpop.permute.xlu0 %1477 }
 0x218   : > { %v1483_v3 = vpop.permute.xlu1 %1482 }
 0x219   : > { %v1376_v6 = vpop.permute.xlu0 %1375 }
 0x21c   : > { %v1381_v5 = vpop.permute.xlu1 %1380 }
 0x21d   : > { %v1488_v8 = vpop.permute.xlu0 %1487 }
 0x220   : > { %v1493_v7 = vpop.permute.xlu1 %1492 }
 0x221   : > { %v3088_v10 = vpop.permute.xlu0 %1385 }
 0x224   : > { %v3086_v9 = vpop.permute.xlu1 %1390 }
 0x225   : > { %v1498_v16 = vpop.permute.xlu0 %1497 }
 0x228   : > { %v3090_v14 = vpop.permute.xlu1 %1502 }
 0x229   : > { %v1396_v30 = vpop.permute.xlu0 %1395 }
 0x22c   : > { %v1401_v26 = vpop.permute.xlu1 %1400 }
 0x22d   : > { %v1508_v58 = vpop.permute.xlu0 %1507 }
 0x230   : > { %v1513_v53 = vpop.permute.xlu1 %1512 }
 0x231   : > { %v1406_v49 = vpop.permute.xlu0 %1405 }
 0x234   : > { %v1411_v48 = vpop.permute.xlu1 %1410 }
 0x2c3   : > { %v2212_v11 = vpop.f32.mrb[16].mxu0 }
 0x2c4   : > { %v1424_v12 = vmul.f32 %v2212_v11, %v1351_v60  ;;  %v1248_v13 = vpop.f32.mrb[17].mxu0 }
 0x2c5   : > { %v1423_v15 = vmul.f32 %v1346_v50, %v1248_v13  ;;  %v1523_v50 = vpop.permute.xlu1 %1522 }
 0x2c6   : > { %v1536_v17 = vadd.f32 %v1463_v61, %v1424_v12 }
 0x2c7   : > { %v1535_v18 = vadd.f32 %v1458_v56, %v1423_v15  ;;  %v2215_v19 = vpop.f32.mrb[18].mxu0  ;;  %v1518_v56 = vpop.permute.xlu0 %1517 }
 0x2c8   : > { %v1552_v20 = vmax.f32 %v1536_v17, 0.0  ;;  %v1426_v21 = vmul.f32 %v2215_v19, %v1361_v62  ;;  %v1258_v22 = vpop.f32.mrb[19].mxu0 }
 0x2c9   : > { %v1551_v23 = vmax.f32 %v1535_v18, 0.0  ;;  %v1425_v24 = vmul.f32 %v1356_v63, %v1258_v22 }
 0x2ca   : > { %v1538_v25 = vadd.f32 %v1473_v0, %v1426_v21 }
 0x2cb   : > { %v2370_v27 = vpack.c.bf16 %v1552_v20, %v1551_v23  ;;  %v1537_v28 = vadd.f32 %v1468_v1, %v1425_v24  ;;  %v2218_v29 = vpop.f32.mrb[20].mxu0 }
 0x2cc   : > { %v1554_v31 = vmax.f32 %v1538_v25, 0.0  ;;  %v1428_v32 = vmul.f32 %v2218_v29, %v1371_v55  ;;  %v1268_v34 = vpop.f32.mrb[21].mxu0 }
 0x2cd   : > { %v1553_v35 = vmax.f32 %v1537_v28, 0.0  ;;  %v1427_v38 = vmul.f32 %v1366_v2, %v1268_v34  ;;  %2371 = vmatprep.subr.bf16.mxu0 %v2370_v27  ;;  %2402 = vmatprep.subr.bf16.mxu1 %v2370_v27  ;;  %v1568_v34 = vld [vmem:[%s3220_s10 + $0x8] sm:$0xff] }
 0x2ce   : > { %v1540_v40 = vadd.f32 %v1483_v3, %v1428_v32  ;;  %2373 = vmatpush3.bf16.msra.mxu0 %v2370_v27  ;;  %2410 = vmatpush3.bf16.msra.mxu1 %v2370_v27 }
 0x2cf   : > { %v2374_v41 = vpack.c.bf16 %v1554_v31, %v1553_v35  ;;  %v1539_v43 = vadd.f32 %v1478_v4, %v1427_v38  ;;  %v2221_v44 = vpop.f32.mrb[22].mxu0  ;;  %v1574_v35 = vld [vmem:[%s3220_s10 + $0x38] sm:$0xff]  ;;  %v1569_v38 = vld [vmem:[%s3220_s10 + $0x10] sm:$0xff] }
 0x2d0   : > { %v1556_v45 = vmax.f32 %v1540_v40, 0.0  ;;  %v1430_v47 = vmul.f32 %v2221_v44, %v1381_v5  ;;  %v1278_v52 = vpop.f32.mrb[23].mxu0  ;;  %v1575_v40 = vld [vmem:[%s3220_s10 + $0x40] sm:$0xff] }
 0x2d1   : > { %v1555_v54 = vmax.f32 %v1539_v43, 0.0  ;;  %v1429_v57 = vmul.f32 %v1376_v6, %v1278_v52  ;;  %2375 = vmatprep.subr.bf16.mxu0 %v2374_v41  ;;  %2403 = vmatprep.subr.bf16.mxu1 %v2374_v41  ;;  %v1421_v6 = vpop.permute.xlu1 %1420  ;;  %v1576_v43 = vld [vmem:[%s3220_s10 + $0x48] sm:$0xff]  ;;  %v1571_v44 = vld [vmem:[%s3220_s10 + $0x20] sm:$0xff]  ;;  %v1578_v52 = vld [vmem:[%s3220_s10 + $0x58] sm:$0xff] }
 0x2d2   : > { %v1542_v33 = vadd.f32 %v1493_v7, %v1430_v47  ;;  %2377 = vmatpush3.bf16.msra.mxu0 %v2374_v41  ;;  %2411 = vmatpush3.bf16.msra.mxu1 %v2374_v41  ;;  %v1570_v41 = vld [vmem:[%s3220_s10 + $0x18] sm:$0xff]  ;;  %v1572_v47 = vld [vmem:[%s3220_s10 + $0x28] sm:$0xff] }
 0x2d3   : > { %v2378_v37 = vpack.c.bf16 %v1556_v45, %v1555_v54  ;;  %v1541_v36 = vadd.f32 %v1488_v8, %v1429_v57  ;;  %v1577_v45 = vld [vmem:[%s3220_s10 + $0x50] sm:$0xff]  ;;  %v1580_v54 = vld [vmem:[%s3220_s10 + $0x68] sm:$0xff] }
 0x2d4   : > { %v1558_v39 = vmax.f32 %v1542_v33, 0.0  ;;  %v1581_v57 = vld [vmem:[%s3220_s10 + $0x70] sm:$0xff] }
 0x2d5   : > { %v1557_v42 = vmax.f32 %v1541_v36, 0.0  ;;  %2379 = vmatprep.subr.bf16.mxu0 %v2378_v37  ;;  %2404 = vmatprep.subr.bf16.mxu1 %v2378_v37  ;;  %v1533_v23 = vpop.permute.xlu1 %1532 }
 0x2d6   : > { %2381 = vmatpush3.bf16.msra.mxu0 %v2378_v37  ;;  %2412 = vmatpush3.bf16.msra.mxu1 %v2378_v37 }
 0x2d7   : > { %v2382_v46 = vpack.c.bf16 %v1558_v39, %v1557_v42 }
 0x2d9   : > { %2383 = vmatprep.subr.bf16.mxu0 %v2382_v46  ;;  %2405 = vmatprep.subr.bf16.mxu1 %v2382_v46  ;;  %v1607_v33 = vpop.permute.xlu1 %1606 }
 0x2da   : > { %2385 = vmatpush3.bf16.msra.mxu0 %v2382_v46  ;;  %2413 = vmatpush3.bf16.msra.mxu1 %v2382_v46 }
 0x2db   : > { %v2224_v59 = vpop.f32.mrb[24].mxu0 }
 0x2dc   : > { %v1432_v51 = vmul.f32 %v2224_v59, %v3086_v9  ;;  %v1288_v60 = vpop.f32.mrb[25].mxu0  ;;  %v1416_v9 = vpop.permute.xlu0 %1415 }
 0x2dd   : > { %v1431_v61 = vmul.f32 %v3088_v10, %v1288_v60  ;;  %v1617_v36 = vpop.permute.xlu1 %1616 }
 0x2de   : > { %v1544_v62 = vadd.f32 %v3090_v14, %v1432_v51 }
 0x2df   : > { %v1543_v63 = vadd.f32 %v1498_v16, %v1431_v61  ;;  %v2227_v0 = vpop.f32.mrb[26].mxu0 }
 0x2e0   : > { %v1560_v1 = vmax.f32 %v1544_v62, 0.0  ;;  %v1434_v55 = vmul.f32 %v2227_v0, %v1401_v26  ;;  %v1298_v2 = vpop.f32.mrb[27].mxu0  ;;  %v1528_v26 = vpop.permute.xlu0 %1527 }
 0x2e1   : > { %v1559_v3 = vmax.f32 %v1543_v63, 0.0  ;;  %v1433_v4 = vmul.f32 %v1396_v30, %v1298_v2  ;;  %v1627_v42 = vpop.permute.xlu1 %1626 }
 0x2e2   : > { %v1546_v5 = vadd.f32 %v1513_v53, %v1434_v55  ;;  %v1579_v53 = vld [vmem:[%s3220_s10 + $0x60] sm:$0xff] }
 0x2e3   : > { %v2386_v7 = vpack.c.bf16 %v1560_v1, %v1559_v3  ;;  %v1545_v8 = vadd.f32 %v1508_v58, %v1433_v4  ;;  %v2230_v11 = vpop.f32.mrb[28].mxu0  ;;  %v1582_v58 = vld [vmem:[%s3220_s10 + $0x78] sm:$0xff] }
 0x2e4   : > { %v1562_v12 = vmax.f32 %v1546_v5, 0.0  ;;  %v1436_v13 = vmul.f32 %v2230_v11, %v1411_v48  ;;  %v1308_v15 = vpop.f32.mrb[29].mxu0  ;;  %v1602_v37 = vpop.permute.xlu0 %1601 }
 0x2e5   : > { %v1561_v10 = vmax.f32 %v1545_v8, 0.0  ;;  %v1435_v17 = vmul.f32 %v1406_v49, %v1308_v15  ;;  %2387 = vmatprep.subr.bf16.mxu0 %v2386_v7  ;;  %2406 = vmatprep.subr.bf16.mxu1 %v2386_v7  ;;  %v1637_v46 = vpop.permute.xlu1 %1636 }
 0x2e6   : > { %v1548_v14 = vadd.f32 %v1523_v50, %v1436_v13  ;;  %2389 = vmatpush3.bf16.msra.mxu0 %v2386_v7  ;;  %2414 = vmatpush3.bf16.msra.mxu1 %v2386_v7 }
 0x2e7   : > { %v2390_v16 = vpack.c.bf16 %v1562_v12, %v1561_v10  ;;  %v1547_v18 = vadd.f32 %v1518_v56, %v1435_v17  ;;  %v2233_v19 = vpop.f32.mrb[30].mxu0 }
 0x2e8   : > { %v1564_v20 = vmax.f32 %v1548_v14, 0.0  ;;  %v1438_v21 = vmul.f32 %v2233_v19, %v1421_v6  ;;  %v1318_v22 = vpop.f32.mrb[31].mxu0  ;;  %v1612_v39 = vpop.permute.xlu0 %1611 }
 0x2e9   : > { %v1563_v24 = vmax.f32 %v1547_v18, 0.0  ;;  %v1437_v25 = vmul.f32 %v1416_v9, %v1318_v22  ;;  %2391 = vmatprep.subr.bf16.mxu0 %v2390_v16  ;;  %2407 = vmatprep.subr.bf16.mxu1 %v2390_v16  ;;  %v1647_v59 = vpop.permute.xlu1 %1646 }
 0x2ea   : > { %v1550_v27 = vadd.f32 %v1533_v23, %v1438_v21  ;;  %2393 = vmatpush3.bf16.msra.mxu0 %v2390_v16  ;;  %2415 = vmatpush3.bf16.msra.mxu1 %v2390_v16 }
 0x2eb   : > { %v2394_v28 = vpack.c.bf16 %v1564_v20, %v1563_v24  ;;  %v1549_v29 = vadd.f32 %v1528_v26, %v1437_v25 }
 0x2ec   : > { %v1566_v30 = vmax.f32 %v1550_v27, 0.0  ;;  %v1622_v48 = vpop.permute.xlu0 %1621 }
 0x2ed   : > { %v1565_v31 = vmax.f32 %v1549_v29, 0.0  ;;  %2395 = vmatprep.subr.bf16.mxu0 %v2394_v28  ;;  %2408 = vmatprep.subr.bf16.mxu1 %v2394_v28  ;;  %v1657_v55 = vpop.permute.xlu1 %1656 }
 0x2ee   : > { %2397 = vmatpush3.bf16.msra.mxu0 %v2394_v28  ;;  %2416 = vmatpush3.bf16.msra.mxu1 %v2394_v28 }
 0x2ef   : > { %v2398_v32 = vpack.c.bf16 %v1566_v30, %v1565_v31 }
 0x2f0   : > { %v1632_v49 = vpop.permute.xlu0 %1631 }
 0x2f1   : > { %2399 = vmatprep.subr.bf16.mxu0 %v2398_v32  ;;  %2409 = vmatprep.subr.bf16.mxu1 %v2398_v32  ;;  %v1667_v16 = vpop.permute.xlu1 %1666 }
 0x2f2   : > { %2401 = vmatpush3.bf16.msra.mxu0 %v2398_v32  ;;  %2417 = vmatpush3.bf16.msra.mxu1 %v2398_v32 }
 0x2f4   : > { %v1642_v51 = vpop.permute.xlu0 %1641 }
 0x2f5   : > { %2267 = vmatmul.mubr.f32.vlgmr.msra.gmra.mrb[32].mxu0 %v1568_v34  ;;  %2276 = vmatmul.mubr.f32.vlgmr.msra.gmra.mrb[16].mxu1 %v1574_v35  ;;  %v1677_v25 = vpop.permute.xlu1 %1676 }
 0x2f6   : > { %2269 = vmatprep.mubr.f32.mxu0 %v1569_v38  ;;  %2278 = vmatprep.mubr.f32.mxu1 %v1575_v40 }
 0x2f8   : > { %v1652_v2 = vpop.permute.xlu0 %1651 }
 0x2f9   : > { %2270 = vmatmul.mubr.f32.gmra.mrb[34].mxu0 %v1570_v41  ;;  %2279 = vmatmul.mubr.f32.gmra.mrb[18].mxu1 %v1576_v43 }
 0x2fa   : > { %2272 = vmatprep.mubr.f32.mxu0 %v1571_v44  ;;  %2281 = vmatprep.mubr.f32.mxu1 %v1577_v45 }
 0x2fc   : > { %v1662_v20 = vpop.permute.xlu0 %1661 }
 0x2fd   : > { %2273 = vmatmul.mubr.f32.gmra.mrb[36].mxu0 %v1572_v47  ;;  %2282 = vmatmul.mubr.f32.gmra.mrb[20].mxu1 %v1578_v52 }
 0x2fe   : > { %2284 = vmatprep.mubr.f32.mxu1 %v1579_v53 }
 0x300   : > { %v1672_v27 = vpop.permute.xlu0 %1671 }
 0x301   : > { %2285 = vmatmul.mubr.f32.gmra.mrb[22].mxu1 %v1580_v54 }
 0x302   : > { %2287 = vmatprep.mubr.f32.mxu1 %v1581_v57 }
 0x305   : > { %2288 = vmatmul.mubr.f32.gmra.mrb[24].mxu1 %v1582_v58 }
 0x3c8   : > { %v2268_v60 = vpop.f32.mrb[32].mxu0  ;;  %v2277_v50 = vpop.f32.mrb[16].mxu1 }
 0x3c9   : > { %v1751_v61 = vadd.f32 %v2268_v60, %v1607_v33  ;;  %v1781_v56 = vadd.f32 %v2277_v50, %v1637_v46  ;;  %v1745_v62 = vpop.f32.mrb[33].mxu0  ;;  %v1775_v63 = vpop.f32.mrb[17].mxu1 }
 0x3ca   : > { %v1746_v0 = vadd.f32 %v1745_v62, %v1602_v37  ;;  %v1776_v1 = vadd.f32 %v1775_v63, %v1632_v49 }
 0x3cb   : > { %1825 = vst [vmem:[%s3140_s26 + $0x8] sm:$0xff] %v1751_v61  ;;  %1831 = vst [vmem:[%s3140_s26 + $0x38] sm:$0xff] %v1781_v56 }
 0x3cc   : > { %1824 = vst [vmem:[%s3140_s26] sm:$0xff] %v1746_v0  ;;  %1830 = vst [vmem:[%s3140_s26 + $0x30] sm:$0xff] %v1776_v1  ;;  %v2271_v3 = vpop.f32.mrb[34].mxu0  ;;  %v2280_v4 = vpop.f32.mrb[18].mxu1 }
 0x3cd   : > { %v1761_v5 = vadd.f32 %v2271_v3, %v1617_v36  ;;  %v1791_v6 = vadd.f32 %v2280_v4, %v1647_v59  ;;  %v1755_v7 = vpop.f32.mrb[35].mxu0  ;;  %v1785_v8 = vpop.f32.mrb[19].mxu1 }
 0x3ce   : > { %v1756_v11 = vadd.f32 %v1755_v7, %v1612_v39  ;;  %v1786_v9 = vadd.f32 %v1785_v8, %v1642_v51 }
 0x3cf   : > { %1827 = vst [vmem:[%s3140_s26 + $0x18] sm:$0xff] %v1761_v5  ;;  %1833 = vst [vmem:[%s3140_s26 + $0x48] sm:$0xff] %v1791_v6 }
 0x3d0   : > { %1826 = vst [vmem:[%s3140_s26 + $0x10] sm:$0xff] %v1756_v11  ;;  %1832 = vst [vmem:[%s3140_s26 + $0x40] sm:$0xff] %v1786_v9  ;;  %v2274_v12 = vpop.f32.mrb[36].mxu0  ;;  %v2283_v13 = vpop.f32.mrb[20].mxu1 }
 0x3d1   : > { %v1771_v15 = vadd.f32 %v2274_v12, %v1627_v42  ;;  %v1801_v10 = vadd.f32 %v2283_v13, %v1657_v55  ;;  %v1765_v17 = vpop.f32.mrb[37].mxu0  ;;  %v1795_v14 = vpop.f32.mrb[21].mxu1 }
 0x3d2   : > { %v1766_v18 = vadd.f32 %v1765_v17, %v1622_v48  ;;  %v1796_v19 = vadd.f32 %v1795_v14, %v1652_v2 }
 0x3d3   : > { %1829 = vst [vmem:[%s3140_s26 + $0x28] sm:$0xff] %v1771_v15  ;;  %1835 = vst [vmem:[%s3140_s26 + $0x58] sm:$0xff] %v1801_v10 }
 0x3d4   : > { %1828 = vst [vmem:[%s3140_s26 + $0x20] sm:$0xff] %v1766_v18  ;;  %1834 = vst [vmem:[%s3140_s26 + $0x50] sm:$0xff] %v1796_v19  ;;  %v2286_v21 = vpop.f32.mrb[22].mxu1 }
 0x3d5   : > { %v1811_v22 = vadd.f32 %v2286_v21, %v1667_v16  ;;  %v1805_v23 = vpop.f32.mrb[23].mxu1 }
 0x3d6   : > { %v1806_v24 = vadd.f32 %v1805_v23, %v1662_v20 }
 0x3d7   : > { %1837 = vst [vmem:[%s3140_s26 + $0x68] sm:$0xff] %v1811_v22 }
 0x3d8   : > { %1836 = vst [vmem:[%s3140_s26 + $0x60] sm:$0xff] %v1806_v24  ;;  %v2289_v26 = vpop.f32.mrb[24].mxu1 }
 0x3d9   : > { %v1821_v28 = vadd.f32 %v2289_v26, %v1677_v25  ;;  %v1815_v29 = vpop.f32.mrb[25].mxu1 }
 0x3da   : > { %v1816_v30 = vadd.f32 %v1815_v29, %v1672_v27 }
 0x3db   : > { %1839 = vst [vmem:[%s3140_s26 + $0x78] sm:$0xff] %v1821_v28 }
 0x3dc   : > { %1838 = vst [vmem:[%s3140_s26 + $0x70] sm:$0xff] %v1816_v30 }
 0x3dd   : > { %2475 = shalt.err (!%p2472_p3)
}
 0x3de   : > { %s2476_s18 = scalar_lea.hbm %s3161_s29, 2048  ;;  %s2480_s23 = scalar_lea.hbm %s3222_s12, 4096 }
 0x3df   : > { %p2477_p4 = scmp.ne.s32.totalorder %s3161_s29, %s2476_s18  ;;  %p2481_p9 = scmp.lt.u32.totalorder %s3161_s29, %s3222_s12 }
 0x3e0   : > { %p2482_p10 = scmp.lt.u32.totalorder %s2480_s23, %s2476_s18  ;;  %p2484_p12 = scmp.lt.u32.totalorder %s2476_s18, %s3161_s29 }
 0x3e1   : > { %p2478_p7 = pnand %p2477_p4, %p2633_p5 }
 0x3e2   : > { %p2483_p11 = por %p2482_p10, %p2481_p9 }
 0x3e3   : > { %p2479_p8 = pneg %p2478_p7 }
 0x3e4   : > { %p2485_p13 = por %p2484_p12, %p2483_p11 }
 0x3e6   : > { %p2486_p0 = pnand %p2485_p13, %p2479_p8 }
 0x3e8   : > { %2489 = shalt.err (!%p2486_p0)
}
 0x3e9   : > { %s2528_s15 = smov 128   ;;  %s2529_s17 = smov 8  }
 0x3ea   : > { %2418 = dma.vmem_to_hbm [thread:$0]  (%p2633_p5), %s3163_s28, 2048, %s3161_s29, %s3169_s25, %s2528_s15, %s2528_s15, %s2529_s17  }
 0x3eb PF: > { %p2424_p1 = scmp.ge.s32.totalorder %s2524_s24, 2  ;;  %s1869_s20 = sand.u32 1, %s2512_s21  }
 0x3ec   : > { %s1870_s18 = scalar_lea.sflag [#allocation4], %s1869_s20 }
 0x3ed   : > { %p2421_p2 = pnand %p2424_p1, %p2637_p6 }
 0x3ef   : > { %2507 = dma.done.wait (!%p2421_p2), %s1870_s18, 2048  }
 0x3f0   : > { %2509 = vsyncadd (!%p2421_p2), %s1870_s18, 4294965248  ;;  %s3228_s26 = sld [smem:[#allocation6_spill]]  ;;  %s3229_s23 = sld [smem:[#allocation7_spill]] }
 0x3f1   : > { %p22_p3 = scmp.ge.s32.totalorder %s2620_s27, 4   ;;  %s3230_s21 = smov %s2516_s22 }
 0x3f2   : > { %s3232_s24 = smov %s2620_s27 }
 0x3f3   :  { %24 = sbr.rel (!%p22_p3) target bundleno = 3 (0x3), region = 103 }
 0x3f6   : > { %s3231_s22 = smov %s3228_s26 }
 0x3fa   :  { %1875 = vsyncpa [#allocation4], 1 }
 0x3fb   :  { %1877 = vsyncpa [#allocation4 + $0x1], 1 }

</bundles_post_ra>
